<compile_context>
chip_gen: v6e
topology: v6e:2x2x1
jax: 0.10.0
libtpu: 0.0.40
codegen_flags: <defaults>
</compile_context>

<pallas_src>
import jax
import jax.numpy as jnp
from jax.experimental import pallas as pl
from jax.experimental.pallas import tpu as pltpu

# ---------------- model config (small, consistent with the module's structure) -------------
B, S = 2, 8            # batch, sequence length
H = 32                 # hidden size (stands in for 768)
NH, DH = 4, 8          # heads, head dim (NH*DH == H)
FF = 64                # intermediate (feed-forward) size
LAYERS = 2             # encoder layers
VOCAB, MAXPOS, TYPES = 100, 16, 2
CLASSES = 5            # classes_len of the final nn.Linear(768, classes_len)
CPAD = 128             # classifier output padded to a full lane width
EPS = 1e-12
DTYPE = jnp.float32


# ================================ fused Pallas kernel ======================================

def _layernorm(x, g, b):
    mu = jnp.mean(x, axis=-1, keepdims=True)
    var = jnp.mean((x - mu) ** 2, axis=-1, keepdims=True)
    return (x - mu) * jax.lax.rsqrt(var + EPS) * g + b


def _bert_kernel(x_ref, mask_ref, emb_ref,
                 w_ref, wi_ref, wf_ref, vec_ref, bi_ref,
                 poolw_ref, poolb_ref, clsw_ref, clsb_ref,
                 out_ref, h_ref, bias_ref):
    """grid = (batch, layer); h_ref carries this batch element's (S, H) hidden states."""
    layer = pl.program_id(1)

    # --- layer 0: (already summed) embeddings -> LayerNorm, init resident slab + bias ----
    @pl.when(layer == 0)
    def _init():
        emb = emb_ref[...]                               # (2, H): [gamma; beta]
        h_ref[...] = _layernorm(x_ref[...], emb[0:1], emb[1:2])
        bias_ref[...] = (mask_ref[...] - 1.0) * 1e9      # (1, S): 0 keep / -1e9 pad

    h = h_ref[...]                                       # (S, H) f32
    bias = bias_ref[...]                                 # (1, S)

    vecs = vec_ref[...]                                  # (9, H) packed per-layer vectors
    bq, bk, bv, bo = vecs[0:1], vecs[1:2], vecs[2:3], vecs[3:4]
    ln1g, ln1b = vecs[4:5], vecs[5:6]
    bf, ln2g, ln2b = vecs[6:7], vecs[7:8], vecs[8:9]

    # --- full-width Q/K/V projections (wq/bq pre-scaled by 1/sqrt(DH) at pack time) ------
    q = jnp.dot(h, w_ref[0], preferred_element_type=jnp.float32) + bq    # (S, H)
    k = jnp.dot(h, w_ref[1], preferred_element_type=jnp.float32) + bk
    v = jnp.dot(h, w_ref[2], preferred_element_type=jnp.float32) + bv

    # --- per-head score/ctx only; heads are static lane slices of the projected slabs ----
    # TODO(synk): at real NH=12 / DH=64 scale run this under lax.fori_loop (vreg pressure).
    ctx_heads = []
    for hd in range(NH):
        sl = slice(hd * DH, (hd + 1) * DH)
        qh, kh, vh = q[:, sl], k[:, sl], v[:, sl]
        s = jax.lax.dot_general(qh, kh, (((1,), (1,)), ((), ())),
                                preferred_element_type=jnp.float32) + bias   # (S, S)
        s = s - jnp.max(s, axis=-1, keepdims=True)
        p = jnp.exp(s)
        p = p * pl.reciprocal(jnp.sum(p, axis=-1, keepdims=True), approx=True)
        ctx_heads.append(jnp.dot(p, vh, preferred_element_type=jnp.float32))  # (S, DH)
    ctx = jnp.concatenate(ctx_heads, axis=-1)                                 # (S, H)

    # --- single full-width output projection, add & norm, FFN, add & norm ----------------
    attn = jnp.dot(ctx, w_ref[3], preferred_element_type=jnp.float32) + bo
    h1 = _layernorm(attn + h, ln1g, ln1b)
    inter = jnp.dot(h1, wi_ref[...], preferred_element_type=jnp.float32) + bi_ref[...]
    # TODO(synk): HF BERT uses exact erf-GELU; tanh approximation is used here because it
    # has a guaranteed Mosaic lowering (small numerical drift vs the PyTorch reference).
    inter = jax.nn.gelu(inter, approximate=True)
    ffn = jnp.dot(inter, wf_ref[...], preferred_element_type=jnp.float32) + bf
    h_new = _layernorm(ffn + h1, ln2g, ln2b)
    h_ref[...] = h_new

    # --- last layer: [CLS]-row pooler (tanh) + dropout(identity) + classifier ------------
    @pl.when(layer == pl.num_programs(1) - 1)
    def _head():
        cls = h_new[0:1, :]                                              # (1, H) CLS row
        pooled = jnp.tanh(jnp.dot(cls, poolw_ref[...],
                                  preferred_element_type=jnp.float32) + poolb_ref[...])
        # self.l2 Dropout: identity at inference time.  128-lane (lane-dense) store.
        out_ref[...] = (jnp.dot(pooled, clsw_ref[...],
                                preferred_element_type=jnp.float32)
                        + clsb_ref[...]).astype(out_ref.dtype)


# ================================ pallas_call wrapper ======================================

@jax.jit
def bert_class_forward(pk, ids, mask, token_type_ids):
    """Replicates BERTClass.forward: BERT pooled output -> dropout(identity) -> linear."""
    # Embedding gathers are XLA glue; everything downstream runs in one fused kernel.
    x_emb = (pk["word_emb"][ids]
             + pk["pos_emb"][:S][None, :, :]
             + pk["type_emb"][token_type_ids]).astype(DTYPE)        # (B, S, H)
    maskf = mask.astype(DTYPE).reshape(B, 1, S)

    logits_pad = pl.pallas_call(
        _bert_kernel,
        out_shape=jax.ShapeDtypeStruct((B, 1, CPAD), DTYPE),
        grid=(B, LAYERS),
        in_specs=[
            pl.BlockSpec((None, S, H), lambda b, l: (b, 0, 0)),        # x_emb (per-batch)
            pl.BlockSpec((None, 1, S), lambda b, l: (b, 0, 0)),        # mask  (per-batch)
            pl.BlockSpec((2, H), lambda b, l: (0, 0)),                 # emb LN gamma/beta
            pl.BlockSpec((None, 4, H, H), lambda b, l: (l, 0, 0, 0)),  # wq|wk|wv|wo
            pl.BlockSpec((None, H, FF), lambda b, l: (l, 0, 0)),       # wi
            pl.BlockSpec((None, FF, H), lambda b, l: (l, 0, 0)),       # wf
            pl.BlockSpec((None, 9, H), lambda b, l: (l, 0, 0)),        # packed H-wide vecs
            pl.BlockSpec((None, 1, FF), lambda b, l: (l, 0, 0)),       # bi
            pl.BlockSpec((H, H), lambda b, l: (0, 0)),                 # pool_w
            pl.BlockSpec((1, H), lambda b, l: (0, 0)),                 # pool_b
            pl.BlockSpec((H, CPAD), lambda b, l: (0, 0)),              # cls_w (lane-padded)
            pl.BlockSpec((1, CPAD), lambda b, l: (0, 0)),              # cls_b (lane-padded)
        ],
        out_specs=pl.BlockSpec((None, 1, CPAD), lambda b, l: (b, 0, 0)),
        scratch_shapes=[
            pltpu.VMEM((S, H), jnp.float32),   # resident hidden states (carried over layers)
            pltpu.VMEM((1, S), jnp.float32),   # additive attention bias (computed once)
        ],
        compiler_params=pltpu.CompilerParams(
            dimension_semantics=("parallel", "arbitrary")),
    )(x_emb, maskf, pk["emb"],
      pk["w"], pk["wi"], pk["wf"], pk["vec"], pk["bi"],
      pk["pool_w"], pk["pool_b"], pk["cls_w"], pk["cls_b"])

    # un-pad the classifier lanes.
    return logits_pad.reshape(B, CPAD)[:, :CLASSES]


# ================================ parameter init & packing =================================

def init_params(key):
    """Standard (HF-layout) synthetic BERT parameters."""
    def nxt():
        nonlocal key
        key, sub = jax.random.split(key)
        return sub

    def w(shape):
        return (0.02 * jax.random.normal(nxt(), shape)).astype(DTYPE)

    def z(shape):
        return jnp.zeros(shape, DTYPE)

    p = {
        "word_emb": w((VOCAB, H)),
        "pos_emb": w((MAXPOS, H)),
        "type_emb": w((TYPES, H)),
        "emb_g": jnp.ones((H,), DTYPE), "emb_b": z((H,)),
        "layers": [],
        "pool_w": w((H, H)), "pool_b": z((H,)),
        "cls_w": w((H, CLASSES)), "cls_b": z((CLASSES,)),
    }
    for _ in range(LAYERS):
        p["layers"].append({
            "wq": w((H, H)), "bq": z((H,)),
            "wk": w((H, H)), "bk": z((H,)),
            "wv": w((H, H)), "bv": z((H,)),
            "wo": w((H, H)), "bo": z((H,)),
            "ln1_g": jnp.ones((H,), DTYPE), "ln1_b": z((H,)),
            "wi": w((H, FF)), "bi": z((FF,)),
            "wf": w((FF, H)), "bf": z((H,)),
            "ln2_g": jnp.ones((H,), DTYPE), "ln2_b": z((H,)),
        })
    return p


def pack_params(p):
    """Pack HF-layout params into the kernel's consolidated, layer-stacked layout."""
    L = p["layers"]
    scale = 1.0 / float(DH) ** 0.5   # folded into wq / bq (host side, free in-kernel)
    return {
        "word_emb": p["word_emb"], "pos_emb": p["pos_emb"], "type_emb": p["type_emb"],
        "emb": jnp.stack([p["emb_g"], p["emb_b"]], axis=0),                      # (2, H)
        "w": jnp.stack([jnp.stack([l["wq"] * scale, l["wk"], l["wv"], l["wo"]], 0)
                        for l in L], 0),                                         # (L, 4, H, H)
        "wi": jnp.stack([l["wi"] for l in L], 0),                                # (L, H, FF)
        "wf": jnp.stack([l["wf"] for l in L], 0),                                # (L, FF, H)
        "vec": jnp.stack([jnp.stack([l["bq"] * scale, l["bk"], l["bv"], l["bo"],
                                     l["ln1_g"], l["ln1_b"], l["bf"],
                                     l["ln2_g"], l["ln2_b"]], 0)
                          for l in L], 0),                                       # (L, 9, H)
        "bi": jnp.stack([l["bi"].reshape(1, FF) for l in L], 0),                 # (L, 1, FF)
        "pool_w": p["pool_w"], "pool_b": p["pool_b"].reshape(1, H),
        "cls_w": jnp.zeros((H, CPAD), DTYPE).at[:, :CLASSES].set(p["cls_w"]),
        "cls_b": jnp.zeros((1, CPAD), DTYPE).at[0, :CLASSES].set(p["cls_b"]),
    }


# ================================ pure-JAX reference =======================================

def bert_class_reference(p, ids, mask, token_type_ids):
    """Pure-JAX reference with HF-layout params (numerical sanity check for the kernel)."""
    def ln(x, g, b):
        mu = x.mean(-1, keepdims=True)
        var = ((x - mu) ** 2).mean(-1, keepdims=True)
        return (x - mu) * jax.lax.rsqrt(var + EPS) * g + b

    h = ln(p["word_emb"][ids] + p["pos_emb"][:S][None] + p["type_emb"][token_type_ids],
           p["emb_g"], p["emb_b"])                                   # (B, S, H)
    bias = (mask.astype(DTYPE) - 1.0)[:, None, None, :] * 1e9        # (B, 1, 1, S)

    def split(t):                                                    # (B,S,H)->(B,NH,S,DH)
        return t.reshape(B, S, NH, DH).transpose(0, 2, 1, 3)

    for l in p["layers"]:
        q = split(h @ l["wq"] + l["bq"])
        k = split(h @ l["wk"] + l["bk"])
        v = split(h @ l["wv"] + l["bv"])
        s = jnp.einsum("bhqd,bhkd->bhqk", q, k) / (DH ** 0.5) + bias
        ctx = jnp.einsum("bhqk,bhkd->bhqd", jax.nn.softmax(s, axis=-1), v)
        ctx = ctx.transpose(0, 2, 1, 3).reshape(B, S, H)
        h = ln(ctx @ l["wo"] + l["bo"] + h, l["ln1_g"], l["ln1_b"])
        ffn = jax.nn.gelu(h @ l["wi"] + l["bi"], approximate=True) @ l["wf"] + l["bf"]
        h = ln(ffn + h, l["ln2_g"], l["ln2_b"])

    pooled = jnp.tanh(h[:, 0, :] @ p["pool_w"] + p["pool_b"])
    return pooled @ p["cls_w"] + p["cls_b"]


# ================================ main =====================================================

if __name__ == "__main__":
    key = jax.random.PRNGKey(0)
    k_param, k_ids = jax.random.split(key)

    params = init_params(k_param)
    packed = pack_params(params)

    ids = jax.random.randint(k_ids, (B, S), 0, VOCAB, dtype=jnp.int32)
    # attention mask: 1 = attend, 0 = padding (mask out the last two tokens of batch item 1)
    mask = jnp.ones((B, S), jnp.int32).at[1, S - 2:].set(0)
    token_type_ids = jnp.zeros((B, S), jnp.int32)

    logits = bert_class_forward(packed, ids, mask, token_type_ids)
    logits = jax.block_until_ready(logits)
    assert logits.shape == (B, CLASSES) and logits.dtype == DTYPE

    ref = bert_class_reference(params, ids, mask, token_type_ids)
    assert jnp.allclose(logits, ref, rtol=5e-2, atol=5e-3), (logits, ref)

    print("KERNEL_OK")
</pallas_src>

<mosaic_0001>
module attributes {stable_mosaic.version = 11 : i64} {
  func.func @_bert_kernel(%arg0: i32, %arg1: i32, %arg2: memref<1x8x32xf32, #tpu.memory_space<vmem>>, %arg3: memref<1x1x8xf32, #tpu.memory_space<vmem>>, %arg4: memref<2x32xf32, #tpu.memory_space<vmem>>, %arg5: memref<1x4x32x32xf32, #tpu.memory_space<vmem>>, %arg6: memref<1x32x64xf32, #tpu.memory_space<vmem>>, %arg7: memref<1x64x32xf32, #tpu.memory_space<vmem>>, %arg8: memref<1x9x32xf32, #tpu.memory_space<vmem>>, %arg9: memref<1x1x64xf32, #tpu.memory_space<vmem>>, %arg10: memref<32x32xf32, #tpu.memory_space<vmem>>, %arg11: memref<1x32xf32, #tpu.memory_space<vmem>>, %arg12: memref<32x128xf32, #tpu.memory_space<vmem>>, %arg13: memref<1x128xf32, #tpu.memory_space<vmem>>, %arg14: memref<1x1x128xf32, #tpu.memory_space<vmem>>, %arg15: memref<8x32xf32, #tpu.memory_space<vmem>>, %arg16: memref<1x8xf32, #tpu.memory_space<vmem>>) attributes {dimension_semantics = [#tpu.dimension_semantics<parallel>, #tpu.dimension_semantics<arbitrary>], iteration_bounds = array<i64: 2, 2>, scalar_prefetch = 0 : i64, scratch_operands = 2 : i64, tpu.core_type = #tpu.core_type<tc>, window_params = [{transform_indices = @transform_0, window_bounds = array<i64: 1, 8, 32>}, {transform_indices = @transform_1, window_bounds = array<i64: 1, 1, 8>}, {pipeline_mode = #tpu.pipeline_mode<synchronous>, transform_indices = @transform_2, window_bounds = array<i64: 2, 32>}, {transform_indices = @transform_3, window_bounds = array<i64: 1, 4, 32, 32>}, {transform_indices = @transform_4, window_bounds = array<i64: 1, 32, 64>}, {transform_indices = @transform_5, window_bounds = array<i64: 1, 64, 32>}, {transform_indices = @transform_6, window_bounds = array<i64: 1, 9, 32>}, {transform_indices = @transform_7, window_bounds = array<i64: 1, 1, 64>}, {pipeline_mode = #tpu.pipeline_mode<synchronous>, transform_indices = @transform_8, window_bounds = array<i64: 32, 32>}, {pipeline_mode = #tpu.pipeline_mode<synchronous>, transform_indices = @transform_9, window_bounds = array<i64: 1, 32>}, {pipeline_mode = #tpu.pipeline_mode<synchronous>, transform_indices = @transform_10, window_bounds = array<i64: 32, 128>}, {pipeline_mode = #tpu.pipeline_mode<synchronous>, transform_indices = @transform_11, window_bounds = array<i64: 1, 128>}, {transform_indices = @transform_12, window_bounds = array<i64: 1, 1, 128>}]} {
    %c0_i32 = arith.constant 0 : i32
    %0 = arith.cmpi eq, %arg1, %c0_i32 : i32
    %1 = arith.extui %0 : i1 to i32
    %c0_i32_0 = arith.constant 0 : i32
    %2 = arith.cmpi ne, %1, %c0_i32_0 : i32
    scf.if %2 {
      %c0_67 = arith.constant 0 : index
      %c0_68 = arith.constant 0 : index
      %180 = vector.load %arg4[%c0_67, %c0_68] : memref<2x32xf32, #tpu.memory_space<vmem>>, vector<2x32xf32>
      %c0_69 = arith.constant 0 : index
      %c0_70 = arith.constant 0 : index
      %c0_71 = arith.constant 0 : index
      %181 = vector.load %arg2[%c0_69, %c0_70, %c0_71] : memref<1x8x32xf32, #tpu.memory_space<vmem>>, vector<1x8x32xf32>
      %182 = vector.shape_cast %181 : vector<1x8x32xf32> to vector<8x32xf32>
      %183 = vector.extract_strided_slice %180 {offsets = [0, 0], sizes = [1, 32], strides = [1, 1]} : vector<2x32xf32> to vector<1x32xf32>
      %184 = vector.extract_strided_slice %180 {offsets = [1, 0], sizes = [1, 32], strides = [1, 1]} : vector<2x32xf32> to vector<1x32xf32>
      %cst_72 = arith.constant dense<0.000000e+00> : vector<8xf32>
      %185 = vector.multi_reduction <add>, %182, %cst_72 [1] : vector<8x32xf32> to vector<8xf32>
      %186 = vector.shape_cast %185 : vector<8xf32> to vector<8x1xf32>
      %cst_73 = arith.constant 3.200000e+01 : f32
      %187 = vector.broadcast %cst_73 : f32 to vector<8x1xf32>
      %188 = arith.divf %186, %187 : vector<8x1xf32>
      %189 = vector.broadcast %188 : vector<8x1xf32> to vector<8x32xf32>
      %190 = arith.subf %182, %189 : vector<8x32xf32>
      %191 = arith.mulf %190, %190 : vector<8x32xf32>
      %cst_74 = arith.constant dense<0.000000e+00> : vector<8xf32>
      %192 = vector.multi_reduction <add>, %191, %cst_74 [1] : vector<8x32xf32> to vector<8xf32>
      %193 = vector.shape_cast %192 : vector<8xf32> to vector<8x1xf32>
      %cst_75 = arith.constant 3.200000e+01 : f32
      %194 = vector.broadcast %cst_75 : f32 to vector<8x1xf32>
      %195 = arith.divf %193, %194 : vector<8x1xf32>
      %196 = vector.broadcast %188 : vector<8x1xf32> to vector<8x32xf32>
      %197 = arith.subf %182, %196 : vector<8x32xf32>
      %cst_76 = arith.constant 9.99999996E-13 : f32
      %198 = vector.broadcast %cst_76 : f32 to vector<8x1xf32>
      %199 = arith.addf %195, %198 : vector<8x1xf32>
      %200 = math.rsqrt %199 : vector<8x1xf32>
      %201 = vector.broadcast %200 : vector<8x1xf32> to vector<8x32xf32>
      %202 = arith.mulf %197, %201 : vector<8x32xf32>
      %203 = vector.broadcast %183 : vector<1x32xf32> to vector<8x32xf32>
      %204 = arith.mulf %202, %203 : vector<8x32xf32>
      %205 = vector.broadcast %184 : vector<1x32xf32> to vector<8x32xf32>
      %206 = arith.addf %204, %205 : vector<8x32xf32>
      %c0_77 = arith.constant 0 : index
      %c0_78 = arith.constant 0 : index
      %207 = vector.load %arg15[%c0_77, %c0_78] : memref<8x32xf32, #tpu.memory_space<vmem>>, vector<8x32xf32>
      tpu.vector_store %arg15[%c0_77, %c0_78], %206 {strides = array<i32>} : memref<8x32xf32, #tpu.memory_space<vmem>>, vector<8x32xf32>,
      %c0_79 = arith.constant 0 : index
      %c0_80 = arith.constant 0 : index
      %c0_81 = arith.constant 0 : index
      %208 = vector.load %arg3[%c0_79, %c0_80, %c0_81] : memref<1x1x8xf32, #tpu.memory_space<vmem>>, vector<1x1x8xf32>
      %209 = vector.shape_cast %208 : vector<1x1x8xf32> to vector<1x8xf32>
      %cst_82 = arith.constant 1.000000e+00 : f32
      %210 = vector.broadcast %cst_82 : f32 to vector<1x8xf32>
      %211 = arith.subf %209, %210 : vector<1x8xf32>
      %cst_83 = arith.constant 1.000000e+09 : f32
      %212 = vector.broadcast %cst_83 : f32 to vector<1x8xf32>
      %213 = arith.mulf %211, %212 : vector<1x8xf32>
      %c0_84 = arith.constant 0 : index
      %c0_85 = arith.constant 0 : index
      %214 = vector.load %arg16[%c0_84, %c0_85] : memref<1x8xf32, #tpu.memory_space<vmem>>, vector<1x8xf32>
      tpu.vector_store %arg16[%c0_84, %c0_85], %213 {strides = array<i32>} : memref<1x8xf32, #tpu.memory_space<vmem>>, vector<1x8xf32>,
    } else {
    }
    %c0 = arith.constant 0 : index
    %c0_1 = arith.constant 0 : index
    %3 = vector.load %arg15[%c0, %c0_1] : memref<8x32xf32, #tpu.memory_space<vmem>>, vector<8x32xf32>
    %c0_2 = arith.constant 0 : index
    %c0_3 = arith.constant 0 : index
    %4 = vector.load %arg16[%c0_2, %c0_3] : memref<1x8xf32, #tpu.memory_space<vmem>>, vector<1x8xf32>
    %c0_4 = arith.constant 0 : index
    %c0_5 = arith.constant 0 : index
    %c0_6 = arith.constant 0 : index
    %5 = vector.load %arg8[%c0_4, %c0_5, %c0_6] : memref<1x9x32xf32, #tpu.memory_space<vmem>>, vector<1x9x32xf32>
    %6 = vector.shape_cast %5 : vector<1x9x32xf32> to vector<9x32xf32>
    %7 = vector.extract_strided_slice %6 {offsets = [0, 0], sizes = [1, 32], strides = [1, 1]} : vector<9x32xf32> to vector<1x32xf32>
    %8 = vector.extract_strided_slice %6 {offsets = [1, 0], sizes = [1, 32], strides = [1, 1]} : vector<9x32xf32> to vector<1x32xf32>
    %9 = vector.extract_strided_slice %6 {offsets = [2, 0], sizes = [1, 32], strides = [1, 1]} : vector<9x32xf32> to vector<1x32xf32>
    %10 = vector.extract_strided_slice %6 {offsets = [3, 0], sizes = [1, 32], strides = [1, 1]} : vector<9x32xf32> to vector<1x32xf32>
    %11 = vector.extract_strided_slice %6 {offsets = [4, 0], sizes = [1, 32], strides = [1, 1]} : vector<9x32xf32> to vector<1x32xf32>
    %12 = vector.extract_strided_slice %6 {offsets = [5, 0], sizes = [1, 32], strides = [1, 1]} : vector<9x32xf32> to vector<1x32xf32>
    %13 = vector.extract_strided_slice %6 {offsets = [6, 0], sizes = [1, 32], strides = [1, 1]} : vector<9x32xf32> to vector<1x32xf32>
    %14 = vector.extract_strided_slice %6 {offsets = [7, 0], sizes = [1, 32], strides = [1, 1]} : vector<9x32xf32> to vector<1x32xf32>
    %15 = vector.extract_strided_slice %6 {offsets = [8, 0], sizes = [1, 32], strides = [1, 1]} : vector<9x32xf32> to vector<1x32xf32>
    %c0_7 = arith.constant 0 : index
    %c0_8 = arith.constant 0 : index
    %c0_9 = arith.constant 0 : index
    %c0_10 = arith.constant 0 : index
    %16 = vector.load %arg5[%c0_7, %c0_8, %c0_9, %c0_10] : memref<1x4x32x32xf32, #tpu.memory_space<vmem>>, vector<1x1x32x32xf32>
    %17 = vector.shape_cast %16 : vector<1x1x32x32xf32> to vector<32x32xf32>
    %cst = arith.constant dense<0.000000e+00> : vector<8x32xf32>
    %18 = tpu.matmul %3, %17, %cst {dimension_numbers = #tpu.dot_dimension_numbers<[1], [0], [0], [1], [0, 0, 1, 1], [], []>} : vector<8x32xf32>, vector<32x32xf32>, vector<8x32xf32> -> vector<8x32xf32>
    %19 = vector.broadcast %7 : vector<1x32xf32> to vector<8x32xf32>
    %20 = arith.addf %18, %19 : vector<8x32xf32>
    %c0_11 = arith.constant 0 : index
    %c1 = arith.constant 1 : index
    %c0_12 = arith.constant 0 : index
    %c0_13 = arith.constant 0 : index
    %21 = vector.load %arg5[%c0_11, %c1, %c0_12, %c0_13] : memref<1x4x32x32xf32, #tpu.memory_space<vmem>>, vector<1x1x32x32xf32>
    %22 = vector.shape_cast %21 : vector<1x1x32x32xf32> to vector<32x32xf32>
    %cst_14 = arith.constant dense<0.000000e+00> : vector<8x32xf32>
    %23 = tpu.matmul %3, %22, %cst_14 {dimension_numbers = #tpu.dot_dimension_numbers<[1], [0], [0], [1], [0, 0, 1, 1], [], []>} : vector<8x32xf32>, vector<32x32xf32>, vector<8x32xf32> -> vector<8x32xf32>
    %24 = vector.broadcast %8 : vector<1x32xf32> to vector<8x32xf32>
    %25 = arith.addf %23, %24 : vector<8x32xf32>
    %c0_15 = arith.constant 0 : index
    %c2 = arith.constant 2 : index
    %c0_16 = arith.constant 0 : index
    %c0_17 = arith.constant 0 : index
    %26 = vector.load %arg5[%c0_15, %c2, %c0_16, %c0_17] : memref<1x4x32x32xf32, #tpu.memory_space<vmem>>, vector<1x1x32x32xf32>
    %27 = vector.shape_cast %26 : vector<1x1x32x32xf32> to vector<32x32xf32>
    %cst_18 = arith.constant dense<0.000000e+00> : vector<8x32xf32>
    %28 = tpu.matmul %3, %27, %cst_18 {dimension_numbers = #tpu.dot_dimension_numbers<[1], [0], [0], [1], [0, 0, 1, 1], [], []>} : vector<8x32xf32>, vector<32x32xf32>, vector<8x32xf32> -> vector<8x32xf32>
    %29 = vector.broadcast %9 : vector<1x32xf32> to vector<8x32xf32>
    %30 = arith.addf %28, %29 : vector<8x32xf32>
    %31 = vector.extract_strided_slice %20 {offsets = [0, 0], sizes = [8, 8], strides = [1, 1]} : vector<8x32xf32> to vector<8x8xf32>
    %32 = vector.extract_strided_slice %25 {offsets = [0, 0], sizes = [8, 8], strides = [1, 1]} : vector<8x32xf32> to vector<8x8xf32>
    %33 = vector.extract_strided_slice %30 {offsets = [0, 0], sizes = [8, 8], strides = [1, 1]} : vector<8x32xf32> to vector<8x8xf32>
    %cst_19 = arith.constant dense<0.000000e+00> : vector<8x8xf32>
    %34 = tpu.matmul %31, %32, %cst_19 {dimension_numbers = #tpu.dot_dimension_numbers<[1], [1], [0], [0], [0, 0, 1, 0], [], []>} : vector<8x8xf32>, vector<8x8xf32>, vector<8x8xf32> -> vector<8x8xf32>
    %35 = vector.broadcast %4 : vector<1x8xf32> to vector<8x8xf32>
    %36 = arith.addf %34, %35 : vector<8x8xf32>
    %cst_20 = arith.constant dense<0xFF800000> : vector<8xf32>
    %37 = vector.multi_reduction <maximumf>, %36, %cst_20 [1] : vector<8x8xf32> to vector<8xf32>
    %38 = vector.shape_cast %37 : vector<8xf32> to vector<8x1xf32>
    %39 = vector.broadcast %38 : vector<8x1xf32> to vector<8x8xf32>
    %40 = arith.subf %36, %39 : vector<8x8xf32>
    %41 = math.exp %40 : vector<8x8xf32>
    %cst_21 = arith.constant dense<0.000000e+00> : vector<8xf32>
    %42 = vector.multi_reduction <add>, %41, %cst_21 [1] : vector<8x8xf32> to vector<8xf32>
    %43 = vector.shape_cast %42 : vector<8xf32> to vector<8x1xf32>
    %44 = tpu.reciprocal %43 {approx = true} : vector<8x1xf32> -> vector<8x1xf32>
    %45 = vector.broadcast %44 : vector<8x1xf32> to vector<8x8xf32>
    %46 = arith.mulf %41, %45 : vector<8x8xf32>
    %cst_22 = arith.constant dense<0.000000e+00> : vector<8x8xf32>
    %47 = tpu.matmul %46, %33, %cst_22 {dimension_numbers = #tpu.dot_dimension_numbers<[1], [0], [0], [1], [0, 0, 1, 1], [], []>} : vector<8x8xf32>, vector<8x8xf32>, vector<8x8xf32> -> vector<8x8xf32>
    %48 = vector.extract_strided_slice %20 {offsets = [0, 8], sizes = [8, 8], strides = [1, 1]} : vector<8x32xf32> to vector<8x8xf32>
    %49 = vector.extract_strided_slice %25 {offsets = [0, 8], sizes = [8, 8], strides = [1, 1]} : vector<8x32xf32> to vector<8x8xf32>
    %50 = vector.extract_strided_slice %30 {offsets = [0, 8], sizes = [8, 8], strides = [1, 1]} : vector<8x32xf32> to vector<8x8xf32>
    %cst_23 = arith.constant dense<0.000000e+00> : vector<8x8xf32>
    %51 = tpu.matmul %48, %49, %cst_23 {dimension_numbers = #tpu.dot_dimension_numbers<[1], [1], [0], [0], [0, 0, 1, 0], [], []>} : vector<8x8xf32>, vector<8x8xf32>, vector<8x8xf32> -> vector<8x8xf32>
    %52 = vector.broadcast %4 : vector<1x8xf32> to vector<8x8xf32>
    %53 = arith.addf %51, %52 : vector<8x8xf32>
    %cst_24 = arith.constant dense<0xFF800000> : vector<8xf32>
    %54 = vector.multi_reduction <maximumf>, %53, %cst_24 [1] : vector<8x8xf32> to vector<8xf32>
    %55 = vector.shape_cast %54 : vector<8xf32> to vector<8x1xf32>
    %56 = vector.broadcast %55 : vector<8x1xf32> to vector<8x8xf32>
    %57 = arith.subf %53, %56 : vector<8x8xf32>
    %58 = math.exp %57 : vector<8x8xf32>
    %cst_25 = arith.constant dense<0.000000e+00> : vector<8xf32>
    %59 = vector.multi_reduction <add>, %58, %cst_25 [1] : vector<8x8xf32> to vector<8xf32>
    %60 = vector.shape_cast %59 : vector<8xf32> to vector<8x1xf32>
    %61 = tpu.reciprocal %60 {approx = true} : vector<8x1xf32> -> vector<8x1xf32>
    %62 = vector.broadcast %61 : vector<8x1xf32> to vector<8x8xf32>
    %63 = arith.mulf %58, %62 : vector<8x8xf32>
    %cst_26 = arith.constant dense<0.000000e+00> : vector<8x8xf32>
    %64 = tpu.matmul %63, %50, %cst_26 {dimension_numbers = #tpu.dot_dimension_numbers<[1], [0], [0], [1], [0, 0, 1, 1], [], []>} : vector<8x8xf32>, vector<8x8xf32>, vector<8x8xf32> -> vector<8x8xf32>
    %65 = vector.extract_strided_slice %20 {offsets = [0, 16], sizes = [8, 8], strides = [1, 1]} : vector<8x32xf32> to vector<8x8xf32>
    %66 = vector.extract_strided_slice %25 {offsets = [0, 16], sizes = [8, 8], strides = [1, 1]} : vector<8x32xf32> to vector<8x8xf32>
    %67 = vector.extract_strided_slice %30 {offsets = [0, 16], sizes = [8, 8], strides = [1, 1]} : vector<8x32xf32> to vector<8x8xf32>
    %cst_27 = arith.constant dense<0.000000e+00> : vector<8x8xf32>
    %68 = tpu.matmul %65, %66, %cst_27 {dimension_numbers = #tpu.dot_dimension_numbers<[1], [1], [0], [0], [0, 0, 1, 0], [], []>} : vector<8x8xf32>, vector<8x8xf32>, vector<8x8xf32> -> vector<8x8xf32>
    %69 = vector.broadcast %4 : vector<1x8xf32> to vector<8x8xf32>
    %70 = arith.addf %68, %69 : vector<8x8xf32>
    %cst_28 = arith.constant dense<0xFF800000> : vector<8xf32>
    %71 = vector.multi_reduction <maximumf>, %70, %cst_28 [1] : vector<8x8xf32> to vector<8xf32>
    %72 = vector.shape_cast %71 : vector<8xf32> to vector<8x1xf32>
    %73 = vector.broadcast %72 : vector<8x1xf32> to vector<8x8xf32>
    %74 = arith.subf %70, %73 : vector<8x8xf32>
    %75 = math.exp %74 : vector<8x8xf32>
    %cst_29 = arith.constant dense<0.000000e+00> : vector<8xf32>
    %76 = vector.multi_reduction <add>, %75, %cst_29 [1] : vector<8x8xf32> to vector<8xf32>
    %77 = vector.shape_cast %76 : vector<8xf32> to vector<8x1xf32>
    %78 = tpu.reciprocal %77 {approx = true} : vector<8x1xf32> -> vector<8x1xf32>
    %79 = vector.broadcast %78 : vector<8x1xf32> to vector<8x8xf32>
    %80 = arith.mulf %75, %79 : vector<8x8xf32>
    %cst_30 = arith.constant dense<0.000000e+00> : vector<8x8xf32>
    %81 = tpu.matmul %80, %67, %cst_30 {dimension_numbers = #tpu.dot_dimension_numbers<[1], [0], [0], [1], [0, 0, 1, 1], [], []>} : vector<8x8xf32>, vector<8x8xf32>, vector<8x8xf32> -> vector<8x8xf32>
    %82 = vector.extract_strided_slice %20 {offsets = [0, 24], sizes = [8, 8], strides = [1, 1]} : vector<8x32xf32> to vector<8x8xf32>
    %83 = vector.extract_strided_slice %25 {offsets = [0, 24], sizes = [8, 8], strides = [1, 1]} : vector<8x32xf32> to vector<8x8xf32>
    %84 = vector.extract_strided_slice %30 {offsets = [0, 24], sizes = [8, 8], strides = [1, 1]} : vector<8x32xf32> to vector<8x8xf32>
    %cst_31 = arith.constant dense<0.000000e+00> : vector<8x8xf32>
    %85 = tpu.matmul %82, %83, %cst_31 {dimension_numbers = #tpu.dot_dimension_numbers<[1], [1], [0], [0], [0, 0, 1, 0], [], []>} : vector<8x8xf32>, vector<8x8xf32>, vector<8x8xf32> -> vector<8x8xf32>
    %86 = vector.broadcast %4 : vector<1x8xf32> to vector<8x8xf32>
    %87 = arith.addf %85, %86 : vector<8x8xf32>
    %cst_32 = arith.constant dense<0xFF800000> : vector<8xf32>
    %88 = vector.multi_reduction <maximumf>, %87, %cst_32 [1] : vector<8x8xf32> to vector<8xf32>
    %89 = vector.shape_cast %88 : vector<8xf32> to vector<8x1xf32>
    %90 = vector.broadcast %89 : vector<8x1xf32> to vector<8x8xf32>
    %91 = arith.subf %87, %90 : vector<8x8xf32>
    %92 = math.exp %91 : vector<8x8xf32>
    %cst_33 = arith.constant dense<0.000000e+00> : vector<8xf32>
    %93 = vector.multi_reduction <add>, %92, %cst_33 [1] : vector<8x8xf32> to vector<8xf32>
    %94 = vector.shape_cast %93 : vector<8xf32> to vector<8x1xf32>
    %95 = tpu.reciprocal %94 {approx = true} : vector<8x1xf32> -> vector<8x1xf32>
    %96 = vector.broadcast %95 : vector<8x1xf32> to vector<8x8xf32>
    %97 = arith.mulf %92, %96 : vector<8x8xf32>
    %cst_34 = arith.constant dense<0.000000e+00> : vector<8x8xf32>
    %98 = tpu.matmul %97, %84, %cst_34 {dimension_numbers = #tpu.dot_dimension_numbers<[1], [0], [0], [1], [0, 0, 1, 1], [], []>} : vector<8x8xf32>, vector<8x8xf32>, vector<8x8xf32> -> vector<8x8xf32>
    %99 = tpu.concatenate %47, %64, %81, %98 in 1 : vector<8x8xf32>, vector<8x8xf32>, vector<8x8xf32>, vector<8x8xf32> -> vector<8x32xf32>
    %c0_35 = arith.constant 0 : index
    %c3 = arith.constant 3 : index
    %c0_36 = arith.constant 0 : index
    %c0_37 = arith.constant 0 : index
    %100 = vector.load %arg5[%c0_35, %c3, %c0_36, %c0_37] : memref<1x4x32x32xf32, #tpu.memory_space<vmem>>, vector<1x1x32x32xf32>
    %101 = vector.shape_cast %100 : vector<1x1x32x32xf32> to vector<32x32xf32>
    %cst_38 = arith.constant dense<0.000000e+00> : vector<8x32xf32>
    %102 = tpu.matmul %99, %101, %cst_38 {dimension_numbers = #tpu.dot_dimension_numbers<[1], [0], [0], [1], [0, 0, 1, 1], [], []>} : vector<8x32xf32>, vector<32x32xf32>, vector<8x32xf32> -> vector<8x32xf32>
    %103 = vector.broadcast %10 : vector<1x32xf32> to vector<8x32xf32>
    %104 = arith.addf %102, %103 : vector<8x32xf32>
    %105 = arith.addf %104, %3 : vector<8x32xf32>
    %cst_39 = arith.constant dense<0.000000e+00> : vector<8xf32>
    %106 = vector.multi_reduction <add>, %105, %cst_39 [1] : vector<8x32xf32> to vector<8xf32>
    %107 = vector.shape_cast %106 : vector<8xf32> to vector<8x1xf32>
    %cst_40 = arith.constant 3.200000e+01 : f32
    %108 = vector.broadcast %cst_40 : f32 to vector<8x1xf32>
    %109 = arith.divf %107, %108 : vector<8x1xf32>
    %110 = vector.broadcast %109 : vector<8x1xf32> to vector<8x32xf32>
    %111 = arith.subf %105, %110 : vector<8x32xf32>
    %112 = arith.mulf %111, %111 : vector<8x32xf32>
    %cst_41 = arith.constant dense<0.000000e+00> : vector<8xf32>
    %113 = vector.multi_reduction <add>, %112, %cst_41 [1] : vector<8x32xf32> to vector<8xf32>
    %114 = vector.shape_cast %113 : vector<8xf32> to vector<8x1xf32>
    %cst_42 = arith.constant 3.200000e+01 : f32
    %115 = vector.broadcast %cst_42 : f32 to vector<8x1xf32>
    %116 = arith.divf %114, %115 : vector<8x1xf32>
    %117 = vector.broadcast %109 : vector<8x1xf32> to vector<8x32xf32>
    %118 = arith.subf %105, %117 : vector<8x32xf32>
    %cst_43 = arith.constant 9.99999996E-13 : f32
    %119 = vector.broadcast %cst_43 : f32 to vector<8x1xf32>
    %120 = arith.addf %116, %119 : vector<8x1xf32>
    %121 = math.rsqrt %120 : vector<8x1xf32>
    %122 = vector.broadcast %121 : vector<8x1xf32> to vector<8x32xf32>
    %123 = arith.mulf %118, %122 : vector<8x32xf32>
    %124 = vector.broadcast %11 : vector<1x32xf32> to vector<8x32xf32>
    %125 = arith.mulf %123, %124 : vector<8x32xf32>
    %126 = vector.broadcast %12 : vector<1x32xf32> to vector<8x32xf32>
    %127 = arith.addf %125, %126 : vector<8x32xf32>
    %c0_44 = arith.constant 0 : index
    %c0_45 = arith.constant 0 : index
    %c0_46 = arith.constant 0 : index
    %128 = vector.load %arg6[%c0_44, %c0_45, %c0_46] : memref<1x32x64xf32, #tpu.memory_space<vmem>>, vector<1x32x64xf32>
    %129 = vector.shape_cast %128 : vector<1x32x64xf32> to vector<32x64xf32>
    %cst_47 = arith.constant dense<0.000000e+00> : vector<8x64xf32>
    %130 = tpu.matmul %127, %129, %cst_47 {dimension_numbers = #tpu.dot_dimension_numbers<[1], [0], [0], [1], [0, 0, 1, 1], [], []>} : vector<8x32xf32>, vector<32x64xf32>, vector<8x64xf32> -> vector<8x64xf32>
    %c0_48 = arith.constant 0 : index
    %c0_49 = arith.constant 0 : index
    %c0_50 = arith.constant 0 : index
    %131 = vector.load %arg9[%c0_48, %c0_49, %c0_50] : memref<1x1x64xf32, #tpu.memory_space<vmem>>, vector<1x1x64xf32>
    %132 = vector.shape_cast %131 : vector<1x1x64xf32> to vector<1x64xf32>
    %133 = vector.broadcast %132 : vector<1x64xf32> to vector<8x64xf32>
    %134 = arith.addf %130, %133 : vector<8x64xf32>
    %135 = arith.mulf %134, %134 : vector<8x64xf32>
    %136 = arith.mulf %134, %135 : vector<8x64xf32>
    %cst_51 = arith.constant 4.471500e-02 : f32
    %137 = vector.broadcast %cst_51 : f32 to vector<8x64xf32>
    %138 = arith.mulf %137, %136 : vector<8x64xf32>
    %139 = arith.addf %134, %138 : vector<8x64xf32>
    %cst_52 = arith.constant 0.797884583 : f32
    %140 = vector.broadcast %cst_52 : f32 to vector<8x64xf32>
    %141 = arith.mulf %140, %139 : vector<8x64xf32>
    %142 = math.tanh %141 : vector<8x64xf32>
    %cst_53 = arith.constant 1.000000e+00 : f32
    %143 = vector.broadcast %cst_53 : f32 to vector<8x64xf32>
    %144 = arith.addf %143, %142 : vector<8x64xf32>
    %cst_54 = arith.constant 5.000000e-01 : f32
    %145 = vector.broadcast %cst_54 : f32 to vector<8x64xf32>
    %146 = arith.mulf %145, %144 : vector<8x64xf32>
    %147 = arith.mulf %134, %146 : vector<8x64xf32>
    %c0_55 = arith.constant 0 : index
    %c0_56 = arith.constant 0 : index
    %c0_57 = arith.constant 0 : index
    %148 = vector.load %arg7[%c0_55, %c0_56, %c0_57] : memref<1x64x32xf32, #tpu.memory_space<vmem>>, vector<1x64x32xf32>
    %149 = vector.shape_cast %148 : vector<1x64x32xf32> to vector<64x32xf32>
    %cst_58 = arith.constant dense<0.000000e+00> : vector<8x32xf32>
    %150 = tpu.matmul %147, %149, %cst_58 {dimension_numbers = #tpu.dot_dimension_numbers<[1], [0], [0], [1], [0, 0, 1, 1], [], []>} : vector<8x64xf32>, vector<64x32xf32>, vector<8x32xf32> -> vector<8x32xf32>
    %151 = vector.broadcast %13 : vector<1x32xf32> to vector<8x32xf32>
    %152 = arith.addf %150, %151 : vector<8x32xf32>
    %153 = arith.addf %152, %127 : vector<8x32xf32>
    %cst_59 = arith.constant dense<0.000000e+00> : vector<8xf32>
    %154 = vector.multi_reduction <add>, %153, %cst_59 [1] : vector<8x32xf32> to vector<8xf32>
    %155 = vector.shape_cast %154 : vector<8xf32> to vector<8x1xf32>
    %cst_60 = arith.constant 3.200000e+01 : f32
    %156 = vector.broadcast %cst_60 : f32 to vector<8x1xf32>
    %157 = arith.divf %155, %156 : vector<8x1xf32>
    %158 = vector.broadcast %157 : vector<8x1xf32> to vector<8x32xf32>
    %159 = arith.subf %153, %158 : vector<8x32xf32>
    %160 = arith.mulf %159, %159 : vector<8x32xf32>
    %cst_61 = arith.constant dense<0.000000e+00> : vector<8xf32>
    %161 = vector.multi_reduction <add>, %160, %cst_61 [1] : vector<8x32xf32> to vector<8xf32>
    %162 = vector.shape_cast %161 : vector<8xf32> to vector<8x1xf32>
    %cst_62 = arith.constant 3.200000e+01 : f32
    %163 = vector.broadcast %cst_62 : f32 to vector<8x1xf32>
    %164 = arith.divf %162, %163 : vector<8x1xf32>
    %165 = vector.broadcast %157 : vector<8x1xf32> to vector<8x32xf32>
    %166 = arith.subf %153, %165 : vector<8x32xf32>
    %cst_63 = arith.constant 9.99999996E-13 : f32
    %167 = vector.broadcast %cst_63 : f32 to vector<8x1xf32>
    %168 = arith.addf %164, %167 : vector<8x1xf32>
    %169 = math.rsqrt %168 : vector<8x1xf32>
    %170 = vector.broadcast %169 : vector<8x1xf32> to vector<8x32xf32>
    %171 = arith.mulf %166, %170 : vector<8x32xf32>
    %172 = vector.broadcast %14 : vector<1x32xf32> to vector<8x32xf32>
    %173 = arith.mulf %171, %172 : vector<8x32xf32>
    %174 = vector.broadcast %15 : vector<1x32xf32> to vector<8x32xf32>
    %175 = arith.addf %173, %174 : vector<8x32xf32>
    %c0_64 = arith.constant 0 : index
    %c0_65 = arith.constant 0 : index
    %176 = vector.load %arg15[%c0_64, %c0_65] : memref<8x32xf32, #tpu.memory_space<vmem>>, vector<8x32xf32>
    tpu.vector_store %arg15[%c0_64, %c0_65], %175 {strides = array<i32>} : memref<8x32xf32, #tpu.memory_space<vmem>>, vector<8x32xf32>,
    %c1_i32 = arith.constant 1 : i32
    %177 = arith.cmpi eq, %arg1, %c1_i32 : i32
    %178 = arith.extui %177 : i1 to i32
    %c0_i32_66 = arith.constant 0 : i32
    %179 = arith.cmpi ne, %178, %c0_i32_66 : i32
    scf.if %179 {
      %180 = vector.extract_strided_slice %175 {offsets = [0, 0], sizes = [1, 32], strides = [1, 1]} : vector<8x32xf32> to vector<1x32xf32>
      %c0_67 = arith.constant 0 : index
      %c0_68 = arith.constant 0 : index
      %181 = vector.load %arg10[%c0_67, %c0_68] : memref<32x32xf32, #tpu.memory_space<vmem>>, vector<32x32xf32>
      %cst_69 = arith.constant dense<0.000000e+00> : vector<1x32xf32>
      %182 = tpu.matmul %180, %181, %cst_69 {dimension_numbers = #tpu.dot_dimension_numbers<[1], [0], [0], [1], [0, 0, 1, 1], [], []>} : vector<1x32xf32>, vector<32x32xf32>, vector<1x32xf32> -> vector<1x32xf32>
      %c0_70 = arith.constant 0 : index
      %c0_71 = arith.constant 0 : index
      %183 = vector.load %arg11[%c0_70, %c0_71] : memref<1x32xf32, #tpu.memory_space<vmem>>, vector<1x32xf32>
      %184 = arith.addf %182, %183 : vector<1x32xf32>
      %185 = math.tanh %184 : vector<1x32xf32>
      %c0_72 = arith.constant 0 : index
      %c0_73 = arith.constant 0 : index
      %186 = vector.load %arg12[%c0_72, %c0_73] : memref<32x128xf32, #tpu.memory_space<vmem>>, vector<32x128xf32>
      %cst_74 = arith.constant dense<0.000000e+00> : vector<1x128xf32>
      %187 = tpu.matmul %185, %186, %cst_74 {dimension_numbers = #tpu.dot_dimension_numbers<[1], [0], [0], [1], [0, 0, 1, 1], [], []>} : vector<1x32xf32>, vector<32x128xf32>, vector<1x128xf32> -> vector<1x128xf32>
      %c0_75 = arith.constant 0 : index
      %c0_76 = arith.constant 0 : index
      %188 = vector.load %arg13[%c0_75, %c0_76] : memref<1x128xf32, #tpu.memory_space<vmem>>, vector<1x128xf32>
      %189 = arith.addf %187, %188 : vector<1x128xf32>
      %c0_77 = arith.constant 0 : index
      %c0_78 = arith.constant 0 : index
      %c0_79 = arith.constant 0 : index
      %190 = vector.load %arg14[%c0_77, %c0_78, %c0_79] : memref<1x1x128xf32, #tpu.memory_space<vmem>>, vector<1x1x128xf32>
      %191 = vector.shape_cast %190 : vector<1x1x128xf32> to vector<1x128xf32>
      %192 = vector.shape_cast %189 : vector<1x128xf32> to vector<1x1x128xf32>
      tpu.vector_store %arg14[%c0_77, %c0_78, %c0_79], %192 {strides = array<i32>} : memref<1x1x128xf32, #tpu.memory_space<vmem>>, vector<1x1x128xf32>,
    } else {
    }
    return
  }
  func.func @transform_0(%arg0: i32, %arg1: i32) -> (i32, i32, i32) {
    %c0_i32 = arith.constant 0 : i32
    %c0_i32_0 = arith.constant 0 : i32
    %c0_i32_1 = arith.constant 0 : i32
    return %arg0, %c0_i32, %c0_i32_0 : i32, i32, i32
  }
  func.func @transform_1(%arg0: i32, %arg1: i32) -> (i32, i32, i32) {
    %c0_i32 = arith.constant 0 : i32
    %c0_i32_0 = arith.constant 0 : i32
    %c0_i32_1 = arith.constant 0 : i32
    return %arg0, %c0_i32, %c0_i32_0 : i32, i32, i32
  }
  func.func @transform_2(%arg0: i32, %arg1: i32) -> (i32, i32) {
    %c0_i32 = arith.constant 0 : i32
    %c0_i32_0 = arith.constant 0 : i32
    %c0_i32_1 = arith.constant 0 : i32
    return %c0_i32, %c0_i32_0 : i32, i32
  }
  func.func @transform_3(%arg0: i32, %arg1: i32) -> (i32, i32, i32, i32) {
    %c0_i32 = arith.constant 0 : i32
    %c0_i32_0 = arith.constant 0 : i32
    %c0_i32_1 = arith.constant 0 : i32
    %c0_i32_2 = arith.constant 0 : i32
    return %arg1, %c0_i32, %c0_i32_0, %c0_i32_1 : i32, i32, i32, i32
  }
  func.func @transform_4(%arg0: i32, %arg1: i32) -> (i32, i32, i32) {
    %c0_i32 = arith.constant 0 : i32
    %c0_i32_0 = arith.constant 0 : i32
    %c0_i32_1 = arith.constant 0 : i32
    return %arg1, %c0_i32, %c0_i32_0 : i32, i32, i32
  }
  func.func @transform_5(%arg0: i32, %arg1: i32) -> (i32, i32, i32) {
    %c0_i32 = arith.constant 0 : i32
    %c0_i32_0 = arith.constant 0 : i32
    %c0_i32_1 = arith.constant 0 : i32
    return %arg1, %c0_i32, %c0_i32_0 : i32, i32, i32
  }
  func.func @transform_6(%arg0: i32, %arg1: i32) -> (i32, i32, i32) {
    %c0_i32 = arith.constant 0 : i32
    %c0_i32_0 = arith.constant 0 : i32
    %c0_i32_1 = arith.constant 0 : i32
    return %arg1, %c0_i32, %c0_i32_0 : i32, i32, i32
  }
  func.func @transform_7(%arg0: i32, %arg1: i32) -> (i32, i32, i32) {
    %c0_i32 = arith.constant 0 : i32
    %c0_i32_0 = arith.constant 0 : i32
    %c0_i32_1 = arith.constant 0 : i32
    return %arg1, %c0_i32, %c0_i32_0 : i32, i32, i32
  }
  func.func @transform_8(%arg0: i32, %arg1: i32) -> (i32, i32) {
    %c0_i32 = arith.constant 0 : i32
    %c0_i32_0 = arith.constant 0 : i32
    %c0_i32_1 = arith.constant 0 : i32
    return %c0_i32, %c0_i32_0 : i32, i32
  }
  func.func @transform_9(%arg0: i32, %arg1: i32) -> (i32, i32) {
    %c0_i32 = arith.constant 0 : i32
    %c0_i32_0 = arith.constant 0 : i32
    %c0_i32_1 = arith.constant 0 : i32
    return %c0_i32, %c0_i32_0 : i32, i32
  }
  func.func @transform_10(%arg0: i32, %arg1: i32) -> (i32, i32) {
    %c0_i32 = arith.constant 0 : i32
    %c0_i32_0 = arith.constant 0 : i32
    %c0_i32_1 = arith.constant 0 : i32
    return %c0_i32, %c0_i32_0 : i32, i32
  }
  func.func @transform_11(%arg0: i32, %arg1: i32) -> (i32, i32) {
    %c0_i32 = arith.constant 0 : i32
    %c0_i32_0 = arith.constant 0 : i32
    %c0_i32_1 = arith.constant 0 : i32
    return %c0_i32, %c0_i32_0 : i32, i32
  }
  func.func @transform_12(%arg0: i32, %arg1: i32) -> (i32, i32, i32) {
    %c0_i32 = arith.constant 0 : i32
    %c0_i32_0 = arith.constant 0 : i32
    %c0_i32_1 = arith.constant 0 : i32
    return %arg0, %c0_i32, %c0_i32_0 : i32, i32, i32
  }
}

</mosaic_0001>

<bundles_post_ra>
// kernel: bert_class_forward.1
= control target key start
LH: loop header
LB: loop body
LE: loop exit
PB: predicated region body
PF: predicated region fallthrough
CT: control target
= control target key end

     0   :  { %s3012_s0 = inlined_call_operand.vmem [shape: f32[2,8,32], index: 0, kind: input, shape index: {}]   ;;  %s3013_s1 = inlined_call_operand.vmem [shape: f32[2,1,8], index: 1, kind: input, shape index: {}]   ;;  %s3014_s2 = inlined_call_operand.vmem [shape: f32[2,32], index: 2, kind: input, shape index: {}]   ;;  %s3015_s3 = inlined_call_operand.vmem [shape: f32[2,4,32,32], index: 3, kind: input, shape index: {}]   ;;  %s3016_s4 = inlined_call_operand.vmem [shape: f32[2,32,64], index: 4, kind: input, shape index: {}]   ;;  %s3017_s5 = inlined_call_operand.vmem [shape: f32[2,64,32], index: 5, kind: input, shape index: {}]   ;;  %s3018_s6 = inlined_call_operand.vmem [shape: f32[2,9,32], index: 6, kind: input, shape index: {}]   ;;  %s3019_s7 = inlined_call_operand.vmem [shape: f32[2,1,64], index: 7, kind: input, shape index: {}]   ;;  %s3020_s8 = inlined_call_operand.vmem [shape: f32[32,32], index: 8, kind: input, shape index: {}]   ;;  %s3021_s9 = inlined_call_operand.vmem [shape: f32[1,32], index: 9, kind: input, shape index: {}]   ;;  %s3022_s10 = inlined_call_operand.vmem [shape: f32[32,128], index: 10, kind: input, shape index: {}]   ;;  %s3023_s11 = inlined_call_operand.vmem [shape: f32[1,128], index: 11, kind: input, shape index: {}]   ;;  %s3024_s12 = inlined_call_operand.hbm [shape: f32[2,1,128], index: 12, kind: output, shape index: {}]  }
   0x1   :  { %3037 = sst [smem:[#allocation18_spill]] %s3012_s0 }
   0x2   :  { %3038 = sst [smem:[#allocation19_spill]] %s3021_s9 }
   0x3   :  { %3039 = sst [smem:[#allocation20_spill]] %s3023_s11 }
   0x4   :  { %3040 = sst [smem:[#allocation21_spill]] %s3024_s12 }
   0x5   :  { %17 = vsyncpa [#allocation5], 0 }
   0x6   :  { %19 = vsyncpa [#allocation5 + $0x1], 0  ;;  %s2639_s21 = smov 0   ;;  %s2641_s22 = smov 0  }
   0x7   :  { %s2643_s23 = smov 0   ;;  %s2645_s24 = smov 0  }
   0x8   :  { %s2647_s25 = smov 0   ;;  %s2649_s26 = smov 0  }
   0x9   :  { %s2651_s27 = smov 0   ;;  %s2653_s28 = smov 0  }
   0xa LB: > { %3041 = sst [smem:[#allocation7_spill]] %s2533_s21  ;;  %s2107_s29 = sadd.s32 4294967295, %s2561_s28   ;;  %s2561_s28 = sphi %s2653_s28, %s25_s28   ;;  %s2557_s27 = sphi %s2651_s27, %s3071_s27   ;;  %s2553_s26 = sphi %s2649_s26, %s3070_s26   ;;  %s2549_s25 = sphi %s2647_s25, %s3069_s25   ;;  %s2545_s24 = sphi %s2645_s24, %s3068_s24   ;;  %s2541_s23 = sphi %s2643_s23, %s3067_s23   ;;  %s2537_s22 = sphi %s2641_s22, %s3073_s22   ;;  %s2533_s21 = sphi %s2639_s21, %s3072_s21  }
   0xb   : > { %3042 = sst [smem:[#allocation8_spill]] %s2541_s23  ;;  %s2108_s30 = sadd.s32 4294967294, %s2561_s28  }
   0xc   : > { %3043 = sst [smem:[#allocation9_spill]] %s2549_s25  ;;  %s34_s13 = sadd.s32 1, %s2553_s26 }
   0xd   : > { %3044 = sst [smem:[#allocation10_spill]] %s2553_s26  ;;  %p35_p0 = scmp.ge.s32.totalorder %s34_s13, 2 }
   0xe   : > { %3045 = sst [smem:[#allocation11_spill]] %s2557_s27  ;;  %s37_s14 = sadd.s32 1, %s2557_s27 }
   0xf   : > { %3046 = sst [smem:[#allocation12_spill]] %s2561_s28  ;;  %p341_p1 = scmp.ne.s32.totalorder %s2541_s23, %s2537_s22 }
  0x10   : > { %p342_p2 = scmp.eq.s32.totalorder %s2107_s29, 3  ;;  %s3075_s13 = smov (%p35_p0, %s34_s13), 0 }
  0x11   : > { %3047 = sst [smem:[#allocation13_spill]] %s3075_s13  ;;  %s3077_s14 = smov (!%p35_p0, %s37_s14), %s2557_s27 }
  0x12   : > { %p2688_p3 = por %p342_p2, %p341_p1  ;;  %p347_p4 = scmp.ne.s32.totalorder %s2537_s22, %s2533_s21 }
  0x13   : > { %p39_p5 = scmp.ge.s32.totalorder %s3077_s14, 2  ;;  %p348_p6 = scmp.eq.s32.totalorder %s2108_s30, 3 }
  0x14   : > { %s3048_s15 = scalar_select %p2688_p3, 1, 0 }
  0x15   : > { %p2111_p7 = scmp.ge.s32.totalorder %s2561_s28, 1  ;;  %p432_p8 = scmp.lt.s32.totalorder %s2561_s28, 5 }
  0x16   : > { %3049 = sst [smem:[#allocation14_spill]] %s3048_s15  ;;  %s3079_s14 = smov (%p39_p5, %s3077_s14), 0 }
  0x17   : > { %3050 = sst [smem:[#allocation15_spill]] %s3079_s14  ;;  %p2698_p9 = por %p348_p6, %p347_p4 }
  0x18   : > { %p433_p10 = pnand %p2111_p7, %p432_p8  ;;  %s328_s17 = ssub.s32 %s2557_s27, %s3079_s14 }
  0x19   : > { %s3051_s16 = scalar_select %p2698_p9, 1, 0 }
  0x1a   : > { %s331_s18 = sadd.s32 1, %s2541_s23  ;;  %p329_p11 = scmp.eq.s32.totalorder %s328_s17, 0 }
  0x1b   : > { %3052 = sst [smem:[#allocation16_spill]] %s3051_s16  ;;  %436 = sbr.rel (%p433_p10) target bundleno = 3187 (0xc73), region = 68 }
  0x1c   : > { %s2706_s19 = scalar_select %p329_p11, %s2541_s23, %s331_s18  }
  0x1d   : > { %p498_p12 = scmp.lt.s32.totalorder (!%p433_p10), %s2549_s25, 1  ;;  %p505_p13 = scmp.lt.s32.totalorder (!%p433_p10), %s2545_s24, 1 }
  0x1e   : > { %3053 = sst [smem:[#allocation17_spill]] %s2706_s19  ;;  %p2121_p0 = scmp.ne.s32.totalorder (!%p433_p10), %s2545_s24, 0 }
  0x1f   : > { %s3054_s0 = sld [smem:[#allocation18_spill]] (!%p433_p10) }
  0x20   : > { %s499_s29 = scalar_select %p498_p12, %s2549_s25, 1 }
  0x21   : > { %s2713_s30 = scalar_select %p505_p13, %s2545_s24, 1 }
  0x22   : > { %s2112_s17 = sshll.u32 %s499_s29, 3  ;;  %s504_s13 = scalar_lea.vmem %s3013_s1, %s499_s29 }
  0x23   : > { %s2162_s19 = sshll.u32 %s2713_s30, 7  ;;  %s2163_s28 = sshll.u32 %s2713_s30, 5 }
  0x24   : > { %s2725_s21 = scalar_lea.vmem %s3015_s3, %s2162_s19  ;;  %s2731_s25 = scalar_lea.vmem %s3016_s4, %s2163_s28 }
  0x25   : > { %s501_s20 = scalar_lea.vmem %s3054_s0, %s2112_s17  ;;  %s2164_s11 = sshll.u32 %s2713_s30, 6 }
  0x26   : > { %s2737_s29 = scalar_lea.vmem %s3017_s5, %s2164_s11  ;;  %s2165_s26 = sshll.u32 %s2713_s30, 4 }
  0x27   : > { %s2743_s18 = scalar_lea.vmem %s3018_s6, %s2165_s26  ;;  %s527_s19 = scalar_lea.vmem %s3019_s7, %s2713_s30 }
  0x28   : > { %s3055_s0 = sand.u32 1, %s2537_s22   ;;  %531 = sbr.rel (%p2121_p0) target bundleno = 355 (0x163), region = 72 }
  0x29   : > { %s2751_s12 = scalar_lea.vmem [#allocation4], %s3055_s0 }
  0x2d   : > { %v533_v0 = vld [vmem:[%s501_s20] sm:$0xff]  ;;  %vm534_vm0 = vcmask 261120   ;;  %vm563_vm1 = vcmask 57344   ;;  %v549_v13 = vlaneseq }
  0x2e   : > { %v535_v1 = vsel %vm534_vm0, %v533_v0, 0.0  ;;  %v560_v7 = vld [vmem:[%s504_s13] sm:$0x1] }
  0x2f   : > { %536 = vadd.xlane.f32.xlu0 %v535_v1  ;;  %v2122_v8 = vadd.f32 -1.0, %v560_v7  ;;  %v550_v14 = vshrl.u32 %v549_v13, 7  ;;  %v532_v16 = vld [vmem:[%s3014_s2] sm:$0x3] }
  0x31   : > { %v562_v9 = vmul.f32 1e+09, %v2122_v8  ;;  %v551_v15 = vsub.s32 0, %v550_v14  ;;  %v556_v17 = vsub.s32 1, %v550_v14 }
  0x33   : > { %564 = vst.msk [vmem:[#allocation3] sm:$0x1] %vm563_vm1, %v562_v9  ;;  %v552_v18 = vrot.slane %v532_v16, %v551_v15  ;;  %v557_v21 = vrot.slane %v532_v16, %v556_v17 }
  0xb8   : > { %v537_v2 = vpop.xlane.xlu0 %536 }
  0xb9   : > { %v539_v3 = vmul.f32 0.03125, %v537_v2 }
  0xbb   : > { %v540_v4 = vsub.f32 %v533_v0, %v539_v3 }
  0xbd   : > { %v541_v5 = vmul.f32 %v540_v4, %v540_v4 }
  0xbf   : > { %v542_v6 = vsel %vm534_vm0, %v541_v5, 0.0 }
  0xc0   : > { %543 = vadd.xlane.f32.xlu0 %v542_v6 }
 0x149   : > { %v544_v10 = vpop.xlane.xlu0 %543 }
 0x14a   : > { %v545_v11 = vmul.f32 0.03125, %v544_v10 }
 0x14c   : > { %v546_v12 = vadd.f32 1e-12, %v545_v11 }
 0x14e   : > { %2443 = vrsqrt.f32 %v546_v12 }
 0x15b   : > { %v2444_v19 = vpop.eup %2443 }
 0x15c   : > { %v548_v20 = vmul.f32 %v2444_v19, %v540_v4 }
 0x15e   : > { %v553_v22 = vmul.f32 %v552_v18, %v548_v20 }
 0x160   : > { %v558_v23 = vadd.f32 %v557_v21, %v553_v22 }
 0x162   : > { %559 = vst.msk [vmem:[#allocation2] sm:$0xff] %vm534_vm0, %v558_v23 }
 0x163 PF: > { %v572_v24 = vld [vmem:[%s2725_s21 + $0x18] sm:$0xff]  ;;  %v2563_v25 = vmov 0.0   ;;  %v571_v26 = vld [vmem:[%s2725_s21 + $0x10] sm:$0xff]  ;;  %vm2564_vm2 = vmmov 0   ;;  %v570_v27 = vld [vmem:[%s2725_s21 + $0x8] sm:$0xff]  ;;  %vm577_vm3 = vcmask 261120   ;;  %v573_v38 = vlaneseq }
 0x164   : > { %2226 = vmatprep.subr.mxu1 %v2563_v25  ;;  %2234 = vmatprep.mubr.msk.f32.mxu1 %vm2564_vm2, %v2563_v25  ;;  %v569_v28 = vld [vmem:[%s2725_s21] sm:$0xff]  ;;  %v2127_v30 = vld [vmem:[%s2725_s21 + $0x38] sm:$0xff]  ;;  %v2126_v31 = vld [vmem:[%s2725_s21 + $0x30] sm:$0xff]  ;;  %vm815_vm4 = vcmask 64512   ;;  %s2565_s11 = smov 112   ;;  %s2566_s28 = smov 120  }
 0x165   : > { %2227 = vmatpush3.msra.mxu1 %v572_v24  ;;  %2248 = vmatprep.subr.mxu0 %v2563_v25  ;;  %v2125_v32 = vld [vmem:[%s2725_s21 + $0x28] sm:$0xff]  ;;  %v2124_v33 = vld [vmem:[%s2725_s21 + $0x20] sm:$0xff]  ;;  %v2132_v34 = vld [vmem:[%s2725_s21 + $0x58] sm:$0xff]  ;;  %v2804_v39 = vshrl.u32 %v573_v38, 7  ;;  %s2567_s13 = smov 104   ;;  %s2568_s15 = smov 8  }
 0x166   : > { %2228 = vmatprep.subr.mxu1 %v2563_v25  ;;  %2256 = vmatprep.mubr.msk.f32.mxu0 %vm2564_vm2, %v2563_v25  ;;  %v2131_v35 = vld [vmem:[%s2725_s21 + $0x50] sm:$0xff]  ;;  %v2130_v36 = vld [vmem:[%s2725_s21 + $0x48] sm:$0xff]  ;;  %v2129_v37 = vld [vmem:[%s2725_s21 + $0x40] sm:$0xff]  ;;  %s2569_s20 = smov 16   ;;  %s2570_s14 = smov 24   ;;  %vm1485_vm5 = vcmask 130048  }
 0x167   : > { %2229 = vmatpush3.msra.mxu1 %v571_v26  ;;  %2249 = vmatpush3.msra.mxu0 %v2132_v34  ;;  %v658_v41 = vsub.s32 1, %v2804_v39  ;;  %v2808_v43 = vld [vmem:[%s2743_s18] sm:$0xff]  ;;  %v575_v44 = vsub.s32 0, %v2804_v39  ;;  %v737_v51 = vsub.s32 2, %v2804_v39  ;;  %v2134_v62 = vld [vmem:[#allocation3] ss:$0 sm:$0xff] }
 0x168   : > { %2230 = vmatprep.subr.mxu1 %v2563_v25  ;;  %2250 = vmatprep.subr.mxu0 %v2563_v25  ;;  %vm1487_vm6 = vcmask 195584   ;;  %vm1701_vm7 = vcmask 523264   ;;  %p2156_p1 = scmp.ne.s32.totalorder %s2545_s24, 1 }
 0x169   : > { %2231 = vmatpush3.msra.mxu1 %v570_v27  ;;  %v2772_v29 = vld [vmem:[#allocation2] sm:$0xff]  ;;  %2251 = vmatpush3.msra.mxu0 %v2131_v35  ;;  %v659_v45 = vrot.slane %v2808_v43, %v658_v41  ;;  %v576_v47 = vrot.slane %v2808_v43, %v575_v44  ;;  %v738_v52 = vrot.slane %v2808_v43, %v737_v51 }
 0x16a   : > { %2232 = vmatprep.subr.mxu1 %v2563_v25  ;;  %2252 = vmatprep.subr.mxu0 %v2563_v25 }
 0x16b   : > { %2233 = vmatpush3.msra.mxu1 %v569_v28  ;;  %2253 = vmatpush3.msra.mxu0 %v2130_v36 }
 0x16c   : > { %2235 = vmatmul.mubr.msk.f32.vlgmr.msra.gmra.mxu1 %vm577_vm3, %v2772_v29  ;;  %2237 = vmatprep.subr.mxu1 %v2563_v25 }
 0x16d   : > { %2238 = vmatpush3.msra.mxu1 %v2127_v30  ;;  %2245 = vmatprep.mubr.msk.f32.mxu1 %vm2564_vm2, %v2563_v25 }
 0x16e   : > { %2239 = vmatprep.subr.mxu1 %v2563_v25  ;;  %2254 = vmatprep.subr.mxu0 %v2563_v25 }
 0x16f   : > { %2240 = vmatpush3.msra.mxu1 %v2126_v31  ;;  %2255 = vmatpush3.msra.mxu0 %v2129_v37 }
 0x170   : > { %2241 = vmatprep.subr.mxu1 %v2563_v25  ;;  %2257 = vmatmul.mubr.msk.f32.vlgmr.msra.gmra.mxu0 %vm577_vm3, %v2772_v29 }
 0x171   : > { %2242 = vmatpush3.msra.mxu1 %v2125_v32  ;;  %2269 = vmatprep.subr.mxu0 %v2563_v25 }
 0x172   : > { %2243 = vmatprep.subr.mxu1 %v2563_v25  ;;  %2271 = vmatprep.mubr.msk.f32.mxu0 %vm2564_vm2, %v2563_v25 }
 0x173   : > { %2244 = vmatpush3.msra.mxu1 %v2124_v33 }
 0x174   : > { %2246 = vmatmul.mubr.msk.f32.vlgmr.msra.gmra.mxu1 %vm577_vm3, %v2772_v29  ;;  %2259 = vmatprep.subr.mxu1 %v2563_v25 }
 0x175   : > { %2261 = vmatprep.mubr.msk.f32.mxu1 %vm2564_vm2, %v2563_v25 }
 0x22c   : > { %v647_v40 = vpop.f32.mrf.mxu1 }
 0x22d   : > { %v648_v50 = vadd.f32 %v647_v40, %v576_v47 }
 0x22e   : > { %v2236_v42 = vpop.f32.mrf.mxu1 }
 0x230   : > { %v805_v53 = vpop.f32.mrf.mxu0 }
 0x231   : > { %v2826_v54 = vadd.f32 %v805_v53, %v738_v52 }
 0x232   : > { %v2258_v55 = vpop.f32.mrf.mxu0 }
 0x234   : > { %v726_v46 = vpop.f32.mrf.mxu1 }
 0x235   : > { %v727_v48 = vadd.f32 %v726_v46, %v659_v45 }
 0x236   : > { %v2247_v49 = vpop.f32.mrf.mxu1 }
 0x237   : > { %1144 = vrot.lane.b32.xlu1 %v727_v48, %s2565_s11  ;;  %978 = vrot.lane.b32.xlu0 %v727_v48, %s2566_s28 }
 0x238   : > { %2260 = vmatpush3.xpose.msk.msra.mxu1 %vm815_vm4, %v727_v48 }
 0x239   : > { %2264 = vmatprep.subr.mxu1 %v2563_v25 }
 0x23b   : > { %2262 = vmatmul.mubr.msk.f32.vlgmr.msra.gmra.mxu1 %vm815_vm4, %v648_v50  ;;  %1142 = vrot.lane.b32.xlu1 %v648_v50, %s2565_s11 }
 0x23c   : > { %976 = vrot.lane.b32.xlu0 %v648_v50, %s2566_s28  ;;  %2266 = vmatprep.mubr.msk.f32.mxu1 %vm2564_vm2, %v2563_v25 }
 0x23d   : > { %2265 = vmatpush3.msra.mxu1 %v2826_v54 }
 0x23e   : > { %2274 = vmatprep.subr.mxu1 %v2563_v25 }
 0x23f   : > { %1307 = vrot.lane.b32.xlu1 %v648_v50, %s2567_s13 }
 0x240   : > { %1309 = vrot.lane.b32.xlu0 %v727_v48, %s2567_s13 }
 0x2a9   : > { %v979_v56 = vpop.permute.xlu0 %978  ;;  %v1145_v57 = vpop.permute.xlu1 %1144 }
 0x2aa   : > { %2270 = vmatpush3.xpose.msk.msra.mxu0 %vm815_vm4, %v979_v56  ;;  %v2150_v56 = vld [vmem:[%s2725_s21 + $0x78] sm:$0xff] }
 0x2ab   : > { %2279 = vmatprep.subr.mxu0 %v2563_v25 }
 0x2ad   : > { %v1143_v59 = vpop.permute.xlu1 %1142 }
 0x2ae   : > { %v977_v58 = vpop.permute.xlu0 %976 }
 0x2af   : > { %2272 = vmatmul.mubr.msk.f32.vlgmr.msra.gmra.mxu0 %vm815_vm4, %v977_v58  ;;  %v2148_v58 = vld [vmem:[%s2725_s21 + $0x68] sm:$0xff] }
 0x2b0   : > { %2280 = vmatpush3.xpose.msk.msra.mxu0 %vm815_vm4, %v1145_v57  ;;  %2281 = vmatprep.mubr.msk.f32.mxu0 %vm2564_vm2, %v2563_v25  ;;  %v2149_v57 = vld [vmem:[%s2725_s21 + $0x70] sm:$0xff] }
 0x2b1   : > { %2289 = vmatprep.subr.mxu0 %v2563_v25  ;;  %v1308_v61 = vpop.permute.xlu1 %1307 }
 0x2b2   : > { %v1310_v60 = vpop.permute.xlu0 %1309 }
 0x2b3   : > { %2282 = vmatmul.mubr.msk.f32.vlgmr.msra.gmra.mxu0 %vm815_vm4, %v1143_v59  ;;  %v2147_v59 = vld [vmem:[%s2725_s21 + $0x60] sm:$0xff]  ;;  %s3056_s21 = sld [smem:[#allocation19_spill]] (!%p2156_p1) }
 0x2b4   : > { %2290 = vmatpush3.xpose.msk.msra.mxu0 %vm815_vm4, %v1310_v60  ;;  %2291 = vmatprep.mubr.msk.f32.mxu0 %vm2564_vm2, %v2563_v25 }
 0x2b5   : > { %2299 = vmatprep.subr.mxu0 %v2563_v25 }
 0x2b7   : > { %2292 = vmatmul.mubr.msk.f32.vlgmr.msra.gmra.mxu0 %vm815_vm4, %v1308_v61 }
 0x2b8   : > { %2307 = vmatprep.mubr.msk.f32.mxu0 %vm2564_vm2, %v2563_v25  ;;  %2300 = vmatpush3.msra.mxu0 %v2150_v56 }
 0x2b9   : > { %2301 = vmatprep.subr.mxu0 %v2563_v25 }
 0x2ba   : > { %2302 = vmatpush3.msra.mxu0 %v2149_v57 }
 0x2bb   : > { %2303 = vmatprep.subr.mxu0 %v2563_v25 }
 0x2bc   : > { %2304 = vmatpush3.msra.mxu0 %v2148_v58  ;;  %v1699_v58 = vsub.s32 6, %v2804_v39 }
 0x2bd   : > { %2305 = vmatprep.subr.mxu0 %v2563_v25 }
 0x2be   : > { %2306 = vmatpush3.msra.mxu0 %v2147_v59  ;;  %v1700_v59 = vrot.slane %v2808_v43, %v1699_v58 }
 0x2bf   : > { %2321 = vmatprep.subr.mxu0 %v2563_v25 }
 0x2fb   : > { %v888_v63 = vpop.f32.mrf.mxu1 }
 0x2fc   : > { %v889_v0 = vadd.f32 %v2134_v62, %v888_v63 }
 0x2fd   : > { %v2263_v1 = vpop.f32.mrf.mxu1 }
 0x2fe   : > { %v892_v2 = vsel %vm815_vm4, %v889_v0, -inf }
 0x2ff   : > { %893 = vmax.xlane.f32.xlu0 %v892_v2 }
 0x36f   : > { %v1050_v3 = vpop.f32.mrf.mxu0 }
 0x370   : > { %v1051_v4 = vadd.f32 %v2134_v62, %v1050_v3 }
 0x371   : > { %v2273_v5 = vpop.f32.mrf.mxu0 }
 0x372   : > { %v1054_v6 = vsel %vm815_vm4, %v1051_v4, -inf }
 0x373   : > { %1055 = vmax.xlane.f32.xlu1 %v1054_v6  ;;  %v1216_v7 = vpop.f32.mrf.mxu0 }
 0x374   : > { %v1217_v8 = vadd.f32 %v2134_v62, %v1216_v7 }
 0x375   : > { %v2283_v9 = vpop.f32.mrf.mxu0 }
 0x376   : > { %v1220_v10 = vsel %vm815_vm4, %v1217_v8, -inf }
 0x377   : > { %v1381_v11 = vpop.f32.mrf.mxu0  ;;  %1221 = vmax.xlane.f32.xlu0 %v1220_v10 }
 0x378   : > { %v1382_v12 = vadd.f32 %v2134_v62, %v1381_v11 }
 0x379   : > { %v2293_v13 = vpop.f32.mrf.mxu0 }
 0x37a   : > { %v1385_v14 = vsel %vm815_vm4, %v1382_v12, -inf }
 0x37b   : > { %1386 = vmax.xlane.f32.xlu0 %v1385_v14 }
 0x384   : > { %1066 = vrot.lane.b32.xlu1 %v2826_v54, %s2566_s28 }
 0x388   : > { %v894_v15 = vpop.xlane.xlu0 %893 }
 0x389   : > { %v895_v16 = vsub.f32 %v889_v0, %v894_v15 }
 0x38b   : > { %v896_v17 = vmul.f32 1.442695, %v895_v16 }
 0x38d   : > { %2445 = vpow2.f32 %v896_v17 }
 0x39a   : > { %v2446_v18 = vpop.eup %2445 }
 0x39b   : > { %v898_v19 = vsel %vm815_vm4, %v2446_v18, 0.0 }
 0x3a8   : > { %899 = vadd.xlane.f32.xlu1 %v898_v19 }
 0x3fc   : > { %v1056_v20 = vpop.xlane.xlu1 %1055 }
 0x3fd   : > { %v1057_v21 = vsub.f32 %v1051_v4, %v1056_v20  ;;  %v1599_v20 = vld [vmem:[%s2731_s25 + $0x18] sm:$0xff] }
 0x3ff   : > { %v1058_v22 = vmul.f32 1.442695, %v1057_v21  ;;  %v1598_v21 = vld [vmem:[%s2731_s25 + $0x10] sm:$0xff] }
 0x400   : > { %v1222_v23 = vpop.xlane.xlu0 %1221  ;;  %v1067_v37 = vpop.permute.xlu1 %1066 }
 0x401   : > { %2447 = vpow2.f32 %v1058_v22  ;;  %v1223_v24 = vsub.f32 %v1217_v8, %v1222_v23  ;;  %v1496_v8 = vsub.s32 3, %v2804_v39  ;;  %v1597_v22 = vld [vmem:[%s2731_s25 + $0x8] sm:$0xff] }
 0x403   : > { %v1224_v26 = vmul.f32 1.442695, %v1223_v24  ;;  %v1497_v9 = vrot.slane %v2808_v43, %v1496_v8 }
 0x404   : > { %v1387_v27 = vpop.xlane.xlu0 %1386 }
 0x405   : > { %2449 = vpow2.f32 %v1224_v26  ;;  %v1388_v28 = vsub.f32 %v1382_v12, %v1387_v27  ;;  %v1588_v27 = vsub.s32 4, %v2804_v39 }
 0x407   : > { %v1389_v30 = vmul.f32 1.442695, %v1388_v28  ;;  %v1593_v28 = vsub.s32 5, %v2804_v39 }
 0x409   : > { %2451 = vpow2.f32 %v1389_v30  ;;  %v1589_v30 = vrot.slane %v2808_v43, %v1588_v27 }
 0x40e   : > { %v2448_v31 = vpop.eup %2447 }
 0x40f   : > { %v1060_v32 = vsel %vm815_vm4, %v2448_v31, 0.0 }
 0x410   : > { %1061 = vadd.xlane.f32.xlu0 %v1060_v32 }
 0x412   : > { %v2450_v33 = vpop.eup %2449 }
 0x413   : > { %v1226_v34 = vsel %vm815_vm4, %v2450_v33, 0.0 }
 0x414   : > { %1227 = vadd.xlane.f32.xlu1 %v1226_v34 }
 0x416   : > { %v2452_v35 = vpop.eup %2451 }
 0x417   : > { %v1391_v36 = vsel %vm815_vm4, %v2452_v35, 0.0 }
 0x418   : > { %1392 = vadd.xlane.f32.xlu0 %v1391_v36  ;;  %v1696_v36 = vld [vmem:[%s2737_s29 + $0x38] sm:$0xff] }
 0x425   : > { %1396 = vrot.lane.b32.xlu1 %v2826_v54, %s2567_s13 }
 0x42e   : > { %1231 = vrot.lane.b32.xlu0 %v2826_v54, %s2565_s11 }
 0x431   : > { %v900_v38 = vpop.xlane.xlu1 %899 }
 0x432   : > { %2453 = vrcp.f32 %v900_v38  ;;  %v1694_v38 = vld [vmem:[%s2737_s29 + $0x28] sm:$0xff] }
 0x43f   : > { %v2454_v40 = vpop.eup %2453 }
 0x440   : > { %v902_v41 = vmul.f32 %v2454_v40, %v2446_v18  ;;  %v1693_v40 = vld [vmem:[%s2737_s29 + $0x20] sm:$0xff] }
 0x442   : > { %2267 = vmatmul.mubr.msk.f32.vlgmr.msra.gmra.mxu1 %vm815_vm4, %v902_v41  ;;  %v1692_v41 = vld [vmem:[%s2737_s29 + $0x18] sm:$0xff] }
 0x443   : > { %2275 = vmatpush3.msra.mxu1 %v1067_v37  ;;  %2276 = vmatprep.mubr.msk.f32.mxu1 %vm2564_vm2, %v2563_v25  ;;  %v1695_v37 = vld [vmem:[%s2737_s29 + $0x30] sm:$0xff] }
 0x444   : > { %2284 = vmatprep.subr.mxu1 %v2563_v25 }
 0x499   : > { %v1062_v42 = vpop.xlane.xlu0 %1061 }
 0x49a   : > { %2455 = vrcp.f32 %v1062_v42  ;;  %v1691_v42 = vld [vmem:[%s2737_s29 + $0x10] sm:$0xff] }
 0x49d   : > { %v1228_v44 = vpop.xlane.xlu1 %1227 }
 0x49e   : > { %2457 = vrcp.f32 %v1228_v44  ;;  %v1690_v44 = vld [vmem:[%s2737_s29 + $0x8] sm:$0xff] }
 0x4a1   : > { %v1393_v45 = vpop.xlane.xlu0 %1392  ;;  %v1397_v51 = vpop.permute.xlu1 %1396 }
 0x4a2   : > { %2459 = vrcp.f32 %v1393_v45  ;;  %v1689_v45 = vld [vmem:[%s2737_s29] sm:$0xff]  ;;  %s3057_s29 = sld [smem:[#allocation20_spill]] (!%p2156_p1) }
 0x4a5   : > { %v1232_v48 = vpop.permute.xlu0 %1231 }
 0x4a7   : > { %v2456_v46 = vpop.eup %2455 }
 0x4a8   : > { %v1064_v47 = vmul.f32 %v2456_v46, %v2448_v31  ;;  %v2152_v46 = vld [vmem:[%s527_s19] ss:$0 sm:$0xff] }
 0x4aa   : > { %2277 = vmatmul.mubr.msk.f32.vlgmr.msra.gmra.mxu1 %vm815_vm4, %v1064_v47 }
 0x4ab   : > { %v2458_v49 = vpop.eup %2457  ;;  %2285 = vmatpush3.msra.mxu1 %v1232_v48  ;;  %2286 = vmatprep.mubr.msk.f32.mxu1 %vm2564_vm2, %v2563_v25 }
 0x4ac   : > { %2294 = vmatprep.subr.mxu1 %v2563_v25  ;;  %v1230_v50 = vmul.f32 %v2458_v49, %v2450_v33  ;;  %v1594_v33 = vrot.slane %v2808_v43, %v1593_v28 }
 0x4ae   : > { %2287 = vmatmul.mubr.msk.f32.vlgmr.msra.gmra.mxu1 %vm815_vm4, %v1230_v50 }
 0x4af   : > { %v2460_v52 = vpop.eup %2459  ;;  %2295 = vmatpush3.msra.mxu1 %v1397_v51  ;;  %2296 = vmatprep.mubr.msk.f32.mxu1 %vm2564_vm2, %v2563_v25 }
 0x4b0   : > { %v1395_v53 = vmul.f32 %v2460_v52, %v2452_v35  ;;  %2310 = vmatprep.subr.mxu1 %v2563_v25 }
 0x4b2   : > { %2297 = vmatmul.mubr.msk.f32.vlgmr.msra.gmra.mxu1 %vm815_vm4, %v1395_v53 }
 0x4b3   : > { %2318 = vmatprep.mubr.msk.f32.mxu1 %vm2564_vm2, %v2563_v25  ;;  %2311 = vmatpush3.msra.mxu1 %v1599_v20 }
 0x4b4   : > { %2312 = vmatprep.subr.mxu1 %v2563_v25 }
 0x4b5   : > { %2313 = vmatpush3.msra.mxu1 %v1598_v21 }
 0x4b6   : > { %2314 = vmatprep.subr.mxu1 %v2563_v25 }
 0x4b7   : > { %2315 = vmatpush3.msra.mxu1 %v1597_v22 }
 0x4b8   : > { %2316 = vmatprep.subr.mxu1 %v2563_v25 }
 0x502   : > { %v972_v54 = vpop.f32.mrf.mxu1 }
 0x504   : > { %v2268_v55 = vpop.f32.mrf.mxu1 }
 0x56a   : > { %v1138_v60 = vpop.f32.mrf.mxu1 }
 0x56b   : > { %1473 = vrot.lane.b32.xlu1 %v1138_v60, %s2568_s15 }
 0x56c   : > { %v2278_v61 = vpop.f32.mrf.mxu1 }
 0x56e   : > { %v1303_v62 = vpop.f32.mrf.mxu1 }
 0x56f   : > { %1477 = vrot.lane.b32.xlu0 %v1303_v62, %s2569_s20 }
 0x570   : > { %v2288_v63 = vpop.f32.mrf.mxu1 }
 0x572   : > { %v1468_v0 = vpop.f32.mrf.mxu1 }
 0x573   : > { %1481 = vrot.lane.b32.xlu1 %v1468_v0, %s2570_s14 }
 0x574   : > { %v2298_v1 = vpop.f32.mrf.mxu1 }
 0x5dd   : > { %v1474_v2 = vpop.permute.xlu1 %1473 }
 0x5de   : > { %v1484_v4 = vsel %vm815_vm4, %v972_v54, %v1474_v2 }
 0x5e1   : > { %v1478_v3 = vpop.permute.xlu0 %1477 }
 0x5e2   : > { %v1486_v5 = vsel %vm1485_vm5, %v1484_v4, %v1478_v3 }
 0x5e5   : > { %v1482_v6 = vpop.permute.xlu1 %1481 }
 0x5e6   : > { %v1488_v7 = vsel %vm1487_vm6, %v1486_v5, %v1482_v6 }
 0x5e7   : > { %2308 = vmatmul.mubr.msk.f32.vlgmr.msra.gmra.mxu0 %vm577_vm3, %v1488_v7 }
 0x5e8   : > { %2337 = vmatprep.mubr.msk.f32.mxu0 %vm2564_vm2, %v2563_v25  ;;  %2322 = vmatpush3.msra.mxu0 %v1696_v36 }
 0x5e9   : > { %2323 = vmatprep.subr.mxu0 %v2563_v25 }
 0x5ea   : > { %2324 = vmatpush3.msra.mxu0 %v1695_v37 }
 0x5eb   : > { %2325 = vmatprep.subr.mxu0 %v2563_v25 }
 0x5ec   : > { %2326 = vmatpush3.msra.mxu0 %v1694_v38 }
 0x5ed   : > { %2327 = vmatprep.subr.mxu0 %v2563_v25 }
 0x5ee   : > { %2328 = vmatpush3.msra.mxu0 %v1693_v40 }
 0x5ef   : > { %2329 = vmatprep.subr.mxu0 %v2563_v25 }
 0x5f0   : > { %2330 = vmatpush3.msra.mxu0 %v1692_v41 }
 0x5f1   : > { %2331 = vmatprep.subr.mxu0 %v2563_v25 }
 0x5f2   : > { %2332 = vmatpush3.msra.mxu0 %v1691_v42 }
 0x5f3   : > { %2333 = vmatprep.subr.mxu0 %v2563_v25 }
 0x5f4   : > { %2334 = vmatpush3.msra.mxu0 %v1690_v44 }
 0x5f5   : > { %2335 = vmatprep.subr.mxu0 %v2563_v25 }
 0x5f6   : > { %2336 = vmatpush3.msra.mxu0 %v1689_v45 }
 0x6a7   : > { %v1567_v10 = vpop.f32.mrf.mxu0 }
 0x6a8   : > { %v1568_v11 = vadd.f32 %v1567_v10, %v1497_v9  ;;  %v1791_v9 = vsub.s32 7, %v2804_v39 }
 0x6a9   : > { %v2309_v12 = vpop.f32.mrf.mxu0 }
 0x6aa   : > { %v1571_v13 = vadd.f32 %v1568_v11, %v2772_v29  ;;  %v1596_v29 = vld [vmem:[%s2731_s25] sm:$0xff]  ;;  %v1792_v10 = vrot.slane %v2808_v43, %v1791_v9 }
 0x6ab   : > { %2317 = vmatpush3.msra.mxu1 %v1596_v29 }
 0x6ac   : > { %v1572_v14 = vsel %vm577_vm3, %v1571_v13, 0.0 }
 0x6ad   : > { %1573 = vadd.xlane.f32.xlu0 %v1572_v14 }
 0x736   : > { %v1574_v15 = vpop.xlane.xlu0 %1573 }
 0x737   : > { %v1576_v16 = vmul.f32 0.03125, %v1574_v15 }
 0x739   : > { %v1577_v17 = vsub.f32 %v1571_v13, %v1576_v16  ;;  %v2155_v13 = vld [vmem:[%s2743_s18 + $0x8] ss:$0 sm:$0xff] }
 0x73b   : > { %v1578_v18 = vmul.f32 %v1577_v17, %v1577_v17 }
 0x73d   : > { %v1579_v19 = vsel %vm577_vm3, %v1578_v18, 0.0 }
 0x73e   : > { %1580 = vadd.xlane.f32.xlu1 %v1579_v19 }
 0x7c7   : > { %v1581_v23 = vpop.xlane.xlu1 %1580 }
 0x7c8   : > { %v1582_v24 = vmul.f32 0.03125, %v1581_v23 }
 0x7ca   : > { %v1583_v26 = vadd.f32 1e-12, %v1582_v24 }
 0x7cc   : > { %2461 = vrsqrt.f32 %v1583_v26 }
 0x7d9   : > { %v2462_v31 = vpop.eup %2461 }
 0x7da   : > { %v1585_v32 = vmul.f32 %v2462_v31, %v1577_v17 }
 0x7dc   : > { %v1590_v34 = vmul.f32 %v1589_v30, %v1585_v32 }
 0x7de   : > { %v1595_v35 = vadd.f32 %v1594_v33, %v1590_v34 }
 0x7e0   : > { %2319 = vmatmul.mubr.msk.f32.vlgmr.msra.gmra.mxu1 %vm577_vm3, %v1595_v35 }
 0x8a0   : > { %v1676_v47 = vpop.f32.mrf.mxu1 }
 0x8a1   : > { %v1677_v48 = vadd.f32 %v2152_v46, %v1676_v47 }
 0x8a2   : > { %v2320_v49 = vpop.f32.mrf.mxu1 }
 0x8a3   : > { %v1680_v50 = vmul.f32 %v1677_v48, %v1677_v48 }
 0x8a5   : > { %v1681_v51 = vmul.f32 %v1680_v50, %v1677_v48 }
 0x8a7   : > { %v1682_v52 = vmul.f32 0.044715, %v1681_v51 }
 0x8a9   : > { %v1683_v53 = vadd.f32 %v1682_v52, %v1677_v48 }
 0x8ab   : > { %v1684_v54 = vmul.f32 0.7978846, %v1683_v53 }
 0x8ad   : > { %2463 = vtanh.f32 %v1684_v54 }
 0x8ba   : > { %v2464_v55 = vpop.eup %2463 }
 0x8bb   : > { %v1686_v56 = vadd.f32 1.0, %v2464_v55 }
 0x8bd   : > { %v1687_v57 = vmul.f32 0.5, %v1686_v56 }
 0x8bf   : > { %v1688_v25 = vmul.f32 %v1687_v57, %v1677_v48 }
 0x8c1   : > { %2338 = vmatmul.mubr.msk.f32.vlgmr.msra.gmra.mxu0 %vm1701_vm7, %v1688_v25 }
 0x981   : > { %v1771_v60 = vpop.f32.mrf.mxu0 }
 0x982   : > { %v1772_v61 = vadd.f32 %v1771_v60, %v1700_v59 }
 0x983   : > { %v2339_v62 = vpop.f32.mrf.mxu0 }
 0x984   : > { %v1775_v63 = vadd.f32 %v1772_v61, %v1595_v35 }
 0x986   : > { %v1776_v0 = vsel %vm577_vm3, %v1775_v63, 0.0 }
 0x987   : > { %1777 = vadd.xlane.f32.xlu0 %v1776_v0 }
 0xa10   : > { %v1778_v1 = vpop.xlane.xlu0 %1777 }
 0xa11   : > { %v1779_v2 = vmul.f32 0.03125, %v1778_v1 }
 0xa13   : > { %v1780_v3 = vsub.f32 %v1775_v63, %v1779_v2 }
 0xa15   : > { %v1781_v4 = vmul.f32 %v1780_v3, %v1780_v3 }
 0xa17   : > { %v1782_v5 = vsel %vm577_vm3, %v1781_v4, 0.0 }
 0xa18   : > { %1783 = vadd.xlane.f32.xlu0 %v1782_v5 }
 0xaa1   : > { %v1784_v6 = vpop.xlane.xlu0 %1783 }
 0xaa2   : > { %v1785_v7 = vmul.f32 0.03125, %v1784_v6 }
 0xaa4   : > { %v1786_v8 = vadd.f32 1e-12, %v1785_v7 }
 0xaa6   : > { %2465 = vrsqrt.f32 %v1786_v8 }
 0xab3   : > { %v2466_v11 = vpop.eup %2465 }
 0xab4   : > { %v1788_v12 = vmul.f32 %v2466_v11, %v1780_v3 }
 0xab6   : > { %v1793_v14 = vmul.f32 %v1792_v10, %v1788_v12  ;;  %1803 = sbr.rel (%p2156_p1) target bundleno = 3161 (0xc59), region = 76 }
 0xab8   : > { %v1798_v15 = vadd.f32 %v2155_v13, %v1793_v14 }
 0xaba   : > { %1799 = vst.msk [vmem:[#allocation2] sm:$0xff] %vm577_vm3, %v1798_v15 }
 0xabb   : > { %v1807_v16 = vld [vmem:[%s3020_s8 + $0x18] sm:$0xff]  ;;  %v2571_v17 = vmov 0.0   ;;  %v1806_v39 = vld [vmem:[%s3020_s8 + $0x10] sm:$0xff]  ;;  %vm2572_vm8 = vmmov 0   ;;  %v1805_v43 = vld [vmem:[%s3020_s8 + $0x8] sm:$0xff] }
 0xabc   : > { %2340 = vmatprep.subr.mxu0 %v2571_v17  ;;  %2348 = vmatprep.mubr.msk.f32.mxu0 %vm2572_vm8, %v2571_v17  ;;  %v1804_v18 = vld [vmem:[%s3020_s8] sm:$0xff]  ;;  %v1886_v19 = vld [vmem:[%s3022_s10 + $0x18] sm:$0xff]  ;;  %v1885_v20 = vld [vmem:[%s3022_s10 + $0x10] sm:$0xff] }
 0xabd   : > { %2341 = vmatpush3.msra.mxu0 %v1807_v16  ;;  %2351 = vmatprep.subr.mxu1 %v2571_v17  ;;  %v1884_v21 = vld [vmem:[%s3022_s10 + $0x8] sm:$0xff]  ;;  %v1883_v22 = vld [vmem:[%s3022_s10] sm:$0xff] }
 0xabe   : > { %2342 = vmatprep.subr.mxu0 %v2571_v17  ;;  %2359 = vmatprep.mubr.msk.f32.mxu1 %vm2572_vm8, %v2571_v17  ;;  %v1808_v29 = vld [vmem:[%s3056_s21] sm:$0x1] }
 0xabf   : > { %2343 = vmatpush3.msra.mxu0 %v1806_v39  ;;  %2352 = vmatpush3.msra.mxu1 %v1886_v19  ;;  %v1887_v28 = vld [vmem:[%s3057_s29] sm:$0x1] }
 0xac0   : > { %2344 = vmatprep.subr.mxu0 %v2571_v17  ;;  %2353 = vmatprep.subr.mxu1 %v2571_v17 }
 0xac1   : > { %2345 = vmatpush3.msra.mxu0 %v1805_v43  ;;  %2354 = vmatpush3.msra.mxu1 %v1885_v20 }
 0xac2   : > { %2346 = vmatprep.subr.mxu0 %v2571_v17  ;;  %2355 = vmatprep.subr.mxu1 %v2571_v17 }
 0xac3   : > { %2347 = vmatpush3.msra.mxu0 %v1804_v18  ;;  %2356 = vmatpush3.msra.mxu1 %v1884_v21 }
 0xac4   : > { %2349 = vmatmul.mubr.msk.f32.vlgmr.msra.gmra.mxu0 %vm577_vm3, %v1798_v15  ;;  %2357 = vmatprep.subr.mxu1 %v2571_v17 }
 0xac5   : > { %2358 = vmatpush3.msra.mxu1 %v1883_v22 }
 0xb84   : > { %v1878_v23 = vpop.f32.mrf.mxu0 }
 0xb85   : > { %v1879_v24 = vadd.f32 %v1878_v23, %v1808_v29 }
 0xb86   : > { %v2350_v26 = vpop.f32.mrf.mxu0 }
 0xb87   : > { %2467 = vtanh.f32 %v1879_v24 }
 0xb94   : > { %v2468_v27 = vpop.eup %2467 }
 0xb95   : > { %2360 = vmatmul.mubr.msk.f32.vlgmr.msra.gmra.mxu1 %vm577_vm3, %v2468_v27 }
 0xc55   : > { %v1957_v30 = vpop.f32.mrf.mxu1 }
 0xc56   : > { %v1958_v31 = vadd.f32 %v1957_v30, %v1887_v28 }
 0xc57   : > { %v2361_v32 = vpop.f32.mrf.mxu1 }
 0xc58   : > { %1961 = vst [vmem:[%s2751_s12] sm:$0x1] %v1958_v31 }
 0xc59 PF: > { %s3058_s26 = sld [smem:[#allocation9_spill]]  ;;  %s1975_s0 = sshll.u32 %s2751_s12, 4  ;;  %s1976_s0 = int_to_ptr.vmem [resolvable:$true] %s1975_s0 }
 0xc5a   : > { %s3060_s23 = sld [smem:[#allocation21_spill]]  ;;  %s3062_s9 = sand.u32 1, %s2537_s22  }
 0xc5b   : > { %s1963_s11 = scalar_lea.sflag [#allocation5], %s3062_s9  ;;  %s2469_s28 = scalar_lea.vmem %s1976_s0, 16 }
 0xc5c   : > { %p2470_p2 = scmp.ne.s32.totalorder %s1976_s0, %s2469_s28  ;;  %s2573_s13 = smov [#allocation4]  }
 0xc5d   : > { %s2473_s15 = sshll.u32 %s2573_s13, 4  ;;  %s2474_s15 = int_to_ptr.vmem [resolvable:$false] %s2473_s15 }
 0xc5e   : > { %p2471_p4 = pnand %p2470_p2, %p2688_p3  ;;  %s2475_s20 = scalar_lea.vmem %s2474_s15, 32 }
 0xc5f   : > { %s2159_s17 = sshll.u32 %s3058_s26, 4  ;;  %p2476_p6 = scmp.lt.s32.totalorder %s1976_s0, %s2474_s15 }
 0xc60   : > { %s3061_s16 = smov %s3060_s23  ;;  %s1973_s19 = scalar_lea.hbm %s3060_s23, %s2159_s17 }
 0xc61   : > { %p2472_p5 = pneg %p2471_p4  ;;  %p2477_p7 = scmp.lt.s32.totalorder %s2475_s20, %s2469_s28 }
 0xc63   : > { %p2478_p8 = por %p2477_p7, %p2476_p6 }
 0xc65   : > { %p2479_p10 = pnand %p2478_p8, %p2472_p5 }
 0xc67   : > { %2482 = shalt.err (!%p2479_p10)
}
 0xc68   : > { %s2483_s14 = scalar_lea.hbm %s1973_s19, 16  ;;  %s2487_s25 = scalar_lea.hbm %s3061_s16, 32 }
 0xc69   : > { %p2484_p11 = scmp.ne.s32.totalorder %s1973_s19, %s2483_s14  ;;  %p2488_p0 = scmp.lt.s32.totalorder %s1973_s19, %s3061_s16 }
 0xc6a   : > { %p2489_p1 = scmp.lt.s32.totalorder %s2487_s25, %s2483_s14 }
 0xc6b   : > { %p2485_p12 = pnand %p2484_p11, %p2688_p3 }
 0xc6c   : > { %p2490_p2 = por %p2489_p1, %p2488_p0 }
 0xc6d   : > { %p2486_p13 = pneg %p2485_p12 }
 0xc6f   : > { %p2491_p4 = pnand %p2490_p2, %p2486_p13 }
 0xc71   : > { %2494 = shalt.err (!%p2491_p4)
}
 0xc72   : > { %2362 = dma.vmem_to_hbm [thread:$0]  (%p2688_p3), %s1976_s0, 16, %s1973_s19, %s1963_s11  }
 0xc73 PF: > { %s3063_s26 = sld [smem:[#allocation12_spill]] }
 0xc74   : > { %s3064_s17 = sld [smem:[#allocation7_spill]] }
 0xc79   : > { %p2368_p5 = scmp.ge.s32.totalorder %s3063_s26, 2 }
 0xc7a   : > { %s1987_s24 = sand.u32 1, %s3064_s17  }
 0xc7b   : > { %p2365_p6 = pnand %p2368_p5, %p2698_p9  ;;  %s1988_s23 = scalar_lea.sflag [#allocation5], %s1987_s24 }
 0xc7d   : > { %p2366_p7 = pneg %p2365_p6 }
 0xc7f   : > { %2528 = dma.done.wait (%p2366_p7), %s1988_s23, 16  }
 0xc80   : > { %2530 = vsyncadd (%p2366_p7), %s1988_s23, 4294967280  ;;  %s25_s28 = sadd.s32 1, %s3063_s26   ;;  %s3066_s9 = sld [smem:[#allocation8_spill]] }
 0xc81   : > { %p22_p8 = scmp.ge.s32.totalorder %s25_s28, 6   ;;  %s3067_s23 = sld [smem:[#allocation17_spill]] }
 0xc82   : > { %s3068_s24 = sld [smem:[#allocation10_spill]]  ;;  %s3072_s21 = smov %s2537_s22 }
 0xc83   : > { %s3069_s25 = sld [smem:[#allocation11_spill]]  ;;  %24 = sbr.rel (!%p22_p8) target bundleno = 10 (0xa), region = 132 }
 0xc84   : > { %s3070_s26 = sld [smem:[#allocation13_spill]] }
 0xc85   : > { %s3071_s27 = sld [smem:[#allocation15_spill]] }
 0xc86   : > { %s3073_s22 = smov %s3066_s9 }
 0xc88   :  { %1992 = vsyncpa [#allocation5], 1 }
 0xc89   :  { %1994 = vsyncpa [#allocation5 + $0x1], 1 }

</bundles_post_ra>
